<compile_context>
chip_gen: v5e
topology: v5e:2x2
jax: 0.10.0
libtpu: 0.0.40
codegen_flags: <defaults>
</compile_context>

<pallas_src>
import functools
import numpy as np

import jax
import jax.numpy as jnp
from jax.experimental import pallas as pl
from jax.experimental.pallas import tpu as pltpu

# ----------------------------- config ---------------------------------------
EMBED_DIM = 32     # embedding_dim
HIDDEN_DIM = 32    # hidden_dim (feed-forward width)
N_HEADS = 4        # n_heads
N_LAYERS = 2       # n_layers
NODE_DIM = 2       # TSP coordinates
TANH_CLIP = 10.0   # decoder tanh clipping constant
MXU_DTYPE = jnp.bfloat16   # matmul operand dtype (accumulation stays f32)


# ------------------------- in-kernel helpers --------------------------------
def _dot(a, b):
    """a @ b on the MXU: bf16 operands, f32 accumulation (2-D operands)."""
    return jax.lax.dot_general(
        a.astype(MXU_DTYPE), b.astype(MXU_DTYPE),
        (((a.ndim - 1,), (0,)), ((), ())),
        preferred_element_type=jnp.float32)


def _layer_norm(x, eps=1e-5):
    # normalization='layer' -> per-token normalization over the embedding dim.
    # TODO(synk): learnable affine params + 'batch' (BatchNorm1d) variant not reconstructed.
    mu = jnp.mean(x, axis=-1, keepdims=True)
    var = jnp.mean((x - mu) ** 2, axis=-1, keepdims=True)
    return (x - mu) * jax.lax.rsqrt(var + eps)


# ------------------------------ fused kernel ---------------------------------
def fused_forward_kernel(h0_ref,
                         wqkv_ref, wo_ref, w1_ref, b1_ref, w2_ref, b2_ref,
                         wgn_ref, dqk_ref,
                         idx_ref, sel_ref,
                         *, n_layers, n_heads, tb, gs, gsp):
    D = wo_ref.shape[-1]
    kd = D // n_heads
    R = tb * gsp
    scale = 1.0 / (kd ** 0.5)
    neg = jnp.float32(-1e9)

    # embedding (x @ W + positional enc) was folded into the wrapper: h0 is (tb, gsp, D)
    h = h0_ref[...].reshape(R, D)                          # (R, D) f32

    # key-padding mask for the encoder softmax (only when gs was padded to gsp)
    key_pad_mask = None
    if gsp > gs:
        key_pad_mask = jax.lax.broadcasted_iota(jnp.int32, (1, 1, gsp), 2) < gs

    # ---- encoder: n_layers x (MHA + skip + LN + FF + skip + LN) ----
    for layer in range(n_layers):                          # static, small
        qkv = _dot(h, wqkv_ref[layer]).reshape(tb, gsp, 3 * D)   # fused Wq|Wk|Wv

        # Fold heads into the leading (batch) axis so the attention below is a
        # SINGLE batched einsum + SINGLE softmax for all heads (no per-head
        # softmax duplication, no 2-batch-dim dot_general).
        qs, ks, vs = [], [], []
        for hd in range(n_heads):                          # static head split
            qs.append(qkv[:, :, hd * kd:(hd + 1) * kd])
            ks.append(qkv[:, :, D + hd * kd:D + (hd + 1) * kd])
            vs.append(qkv[:, :, 2 * D + hd * kd:2 * D + (hd + 1) * kd])
        qh = jnp.concatenate(qs, axis=0)                   # (n_heads*tb, gsp, kd)
        kh = jnp.concatenate(ks, axis=0)
        vh = jnp.concatenate(vs, axis=0)

        logits = jnp.einsum('bqd,bkd->bqk', qh, kh,
                            preferred_element_type=jnp.float32) * scale
        if key_pad_mask is not None:
            logits = jnp.where(key_pad_mask, logits, neg)
        m = jnp.max(logits, axis=-1, keepdims=True)
        e = jnp.exp(logits - m)
        inv = pl.reciprocal(jnp.sum(e, axis=-1, keepdims=True), approx=True)
        ctx = jnp.einsum('bqk,bkd->bqd', e * inv, vh,
                         preferred_element_type=jnp.float32)     # (n_heads*tb, gsp, kd)

        heads_cat = jnp.concatenate(
            [ctx[hd * tb:(hd + 1) * tb] for hd in range(n_heads)],
            axis=-1).reshape(R, D)
        mha = _dot(heads_cat, wo_ref[layer])               # single Wo matmul

        h1 = _layer_norm(h + mha)                          # skip + norm
        ff = jnp.maximum(_dot(h1, w1_ref[layer]) + b1_ref[layer], 0.0)
        ff = _dot(ff, w2_ref[layer]) + b2_ref[layer]
        h = _layer_norm(h1 + ff)                           # skip + norm

    # ---- max-pool over nodes + project_graph / project_node + fusion ----
    h3 = h.reshape(tb, gsp, D)
    if gsp > gs:
        node_mask = jax.lax.broadcasted_iota(jnp.int32, (tb, gsp, 1), 1) < gs
        gmax = jnp.max(jnp.where(node_mask, h3, jnp.float32(-1e30)), axis=1)
    else:
        gmax = jnp.max(h3, axis=1)                         # (tb, D) == h_em.max(1)[0]
    gfeat = _dot(gmax, wgn_ref[0])                         # project_graph
    nfeat = _dot(h, wgn_ref[1])                            # project_node
    fusion = nfeat.reshape(tb, gsp, D) + gfeat.reshape(tb, 1, D)

    # ---- decoder: pair compatibility -> tanh clip -> mask -> log-softmax ----
    qk = _dot(fusion.reshape(R, D), dqk_ref[...])          # (R, 2D) fused Wq|Wk
    Q = qk[:, :D].reshape(tb, gsp, D)
    K = qk[:, D:].reshape(tb, gsp, D)
    compat = jnp.einsum('bqd,bkd->bqk', Q, K,
                        preferred_element_type=jnp.float32) * (1.0 / (D ** 0.5))
    compat = TANH_CLIP * jnp.tanh(compat)                  # (tb, gsp, gsp)

    row = jax.lax.broadcasted_iota(jnp.int32, (tb, gsp, gsp), 1)
    col = jax.lax.broadcasted_iota(jnp.int32, (tb, gsp, gsp), 2)
    invalid = (col == row) | (col >= gs) | (row >= gs)     # no self-exchange + padding
    compat = jnp.where(invalid, neg, compat)
    # TODO(synk): masking of the previous `exchange` action not reconstructed.

    # exact log-softmax over the gs*gs candidate pairs (per batch element)
    m0 = jnp.max(jnp.max(compat, axis=2, keepdims=True), axis=1, keepdims=True)
    e = jnp.exp(compat - m0)
    s = jnp.sum(jnp.sum(e, axis=2, keepdims=True), axis=1, keepdims=True)
    ll = compat - m0 - jnp.log(s)                          # log_likelihood

    # ---- in-kernel greedy argmax: argmax(M_value) == argmax(ll) ----
    sel = jnp.max(jnp.max(ll, axis=2, keepdims=True), axis=1, keepdims=True)   # (tb,1,1)
    flat = (row * gs + col).astype(jnp.float32)            # flattened pair index
    flat = jnp.where(ll >= sel, flat, jnp.float32(2 ** 30))
    idx = jnp.min(jnp.min(flat, axis=2, keepdims=True), axis=1, keepdims=True)

    idx_ref[...] = idx.reshape(tb, 1).astype(jnp.int32)    # selected pair index
    sel_ref[...] = sel.reshape(tb, 1)                      # its log-likelihood


# --------------------------- pallas wrapper ---------------------------------
def _vmem_limit_bytes():
    """Per-generation VMEM budget: ~3/4 of physical (v5e/v6e: 128 MiB, v7x: 64 MiB)."""
    try:
        cap = int(pltpu.get_tpu_info().vmem_capacity_bytes)
    except Exception:
        cap = 64 * 1024 * 1024          # conservative fallback (v7x per-core VMEM)
    return int(min(cap * 3 // 4, 100 * 1024 * 1024))


def _pick_block_batch(bs, gsp, vmem_budget_bytes, target_rows=4096):
    """Batch elements per grid step.  Large tiles amortize the ~0.35us/step grid
    overhead and the constant-weight DMA; capped by a rough per-batch-element
    activation footprint so the tile fits the per-generation VMEM budget."""
    per_be = 4 * gsp * (12 * EMBED_DIM + 2 * HIDDEN_DIM + (N_HEADS + 3) * gsp)
    cap_tb = max(1, (vmem_budget_bytes // 3) // max(per_be, 1))
    tb = min(bs, max(1, target_rows // max(gsp, 1)), cap_tb)
    if tb >= bs:
        return bs, bs                    # single grid step covers the whole batch
    tb = max(8, (tb // 8) * 8)           # keep (tb, 1) output blocks sublane-aligned
    bs_pad = -(-bs // tb) * tb           # pad batch instead of shrinking tb
    return tb, bs_pad


def run_fused_forward(h0, packed, gs):
    bs, gsp, D = h0.shape
    H = HIDDEN_DIM
    vmem_limit = _vmem_limit_bytes()
    tb, bs_pad = _pick_block_batch(bs, gsp, vmem_limit)
    if bs_pad > bs:
        h0 = jnp.pad(h0, ((0, bs_pad - bs), (0, 0), (0, 0)))
    nblk = bs_pad // tb

    kernel = functools.partial(fused_forward_kernel, n_layers=N_LAYERS,
                               n_heads=N_HEADS, tb=tb, gs=gs, gsp=gsp)

    def const(shape):
        return pl.BlockSpec(shape, lambda b: (0,) * len(shape))

    idx, sel = pl.pallas_call(
        kernel,
        out_shape=(jax.ShapeDtypeStruct((bs_pad, 1), jnp.int32),
                   jax.ShapeDtypeStruct((bs_pad, 1), jnp.float32)),
        grid=(nblk,),
        in_specs=[
            pl.BlockSpec((tb, gsp, D), lambda b: (b, 0, 0)),   # embedded nodes
            const((N_LAYERS, D, 3 * D)),      # fused Wq|Wk|Wv per layer (bf16)
            const((N_LAYERS, D, D)),          # Wo per layer (bf16)
            const((N_LAYERS, D, H)),          # FF w1 (bf16)
            const((N_LAYERS, 1, H)),          # FF b1 (f32)
            const((N_LAYERS, H, D)),          # FF w2 (bf16)
            const((N_LAYERS, 1, D)),          # FF b2 (f32)
            const((2, D, D)),                 # project_graph | project_node (bf16)
            const((D, 2 * D)),                # decoder Wq|Wk (bf16)
        ],
        out_specs=(pl.BlockSpec((tb, 1), lambda b: (b, 0)),
                   pl.BlockSpec((tb, 1), lambda b: (b, 0))),
        compiler_params=pltpu.CompilerParams(
            dimension_semantics=("parallel",),
            vmem_limit_bytes=vmem_limit),
    )(h0, packed["wqkv"], packed["wo"], packed["w1"], packed["b1"],
      packed["w2"], packed["b2"], packed["wgn"], packed["dec_wqk"])
    return idx[:bs, 0], sel[:bs, 0]


# ------------------------------ JAX glue --------------------------------------
def sinusoid_table(n_position, emb_dim):
    pos = np.arange(1, n_position + 1)[:, None].astype(np.float64)
    j = np.arange(emb_dim)[None, :]
    angle = pos / np.power(10000.0, 2 * (j // 2) / emb_dim)
    table = np.zeros((n_position, emb_dim), np.float32)
    table[:, 0::2] = np.sin(angle[:, 0::2])
    table[:, 1::2] = np.cos(angle[:, 1::2])
    return jnp.asarray(table)


def visited_time(solutions):
    """Walk the next-node linked list to get each node's visit order."""
    bs, gs = solutions.shape
    barange = jnp.arange(bs)

    def body(i, carry):
        pre, vt = carry
        cur = solutions[barange, pre]
        vt = vt.at[barange, cur].set(i + 1)
        return cur, vt

    pre0 = jnp.zeros((bs,), solutions.dtype)
    vt0 = jnp.zeros((bs, gs), jnp.int32)
    _, vt = jax.lax.fori_loop(0, gs, body, (pre0, vt0))
    return vt % gs


def init_params(key):
    D, H, ND = EMBED_DIM, HIDDEN_DIM, NODE_DIM
    keys = iter(jax.random.split(key, 8 + 8 * N_LAYERS))

    def u(shape, fan_in):
        b = 1.0 / np.sqrt(fan_in)
        return jax.random.uniform(next(keys), shape, jnp.float32, -b, b)

    params = {
        "embed_w": u((ND, D), ND),
        "encoder": [],
        "wg": u((D, D), D),       # project_graph (bias=False)
        "wn": u((D, D), D),       # project_node  (bias=False)
        "dec_wq": u((D, D), D),
        "dec_wk": u((D, D), D),
    }
    for _ in range(N_LAYERS):
        params["encoder"].append({
            "wq": u((D, D), D), "wk": u((D, D), D),
            "wv": u((D, D), D), "wo": u((D, D), D),
            "w1": u((D, H), D), "b1": u((1, H), D),
            "w2": u((H, D), H), "b2": u((1, D), H),
        })
    return params


def pack_params(params):
    """Stack / concatenate weights into a few dense kernel inputs.
    MXU weights are pre-cast to bf16 (accumulation in-kernel stays f32)."""
    enc = params["encoder"]
    mx = MXU_DTYPE
    return {
        "wqkv": jnp.stack([jnp.concatenate([lp["wq"], lp["wk"], lp["wv"]], axis=1)
                           for lp in enc]).astype(mx),
        "wo": jnp.stack([lp["wo"] for lp in enc]).astype(mx),
        "w1": jnp.stack([lp["w1"] for lp in enc]).astype(mx),
        "b1": jnp.stack([lp["b1"] for lp in enc]),
        "w2": jnp.stack([lp["w2"] for lp in enc]).astype(mx),
        "b2": jnp.stack([lp["b2"] for lp in enc]),
        "wgn": jnp.stack([params["wg"], params["wn"]]).astype(mx),
        "dec_wqk": jnp.concatenate([params["dec_wq"], params["dec_wk"]],
                                   axis=1).astype(mx),
    }


def attention_model_forward(params, x, solutions, exchange, do_sample=False):
    del exchange  # TODO(synk): previous-exchange masking in the decoder not reconstructed
    # TODO(synk): do_sample=True (multinomial sampling) path not implemented; argmax only.
    bs, gs, _ = x.shape

    # EmbeddingNet: node_dim=2 linear + tour-ordered sinusoidal positional encoding
    table = sinusoid_table(gs, EMBED_DIM)
    pos_enc = jnp.take(table, visited_time(solutions), axis=0)          # (bs, gs, D)
    h0 = jnp.einsum('bgn,nd->bgd', x, params["embed_w"],
                    preferred_element_type=jnp.float32) + pos_enc       # (bs, gs, D)

    # pad graph size to a sublane multiple (padded nodes masked in-kernel)
    gsp = ((gs + 7) // 8) * 8
    if gsp > gs:
        h0 = jnp.pad(h0, ((0, 0), (0, gsp - gs), (0, 0)))

    packed = pack_params(params)
    flat_idx, sel_ll = run_fused_forward(h0, packed, gs)

    pair_index = flat_idx.reshape(-1, 1)
    col = pair_index % gs
    row = pair_index // gs
    pair = jnp.concatenate([row, col], axis=-1)
    return pair, jnp.squeeze(sel_ll)


# ------------------------------- main -----------------------------------------
if __name__ == "__main__":
    key = jax.random.PRNGKey(0)
    bs, gs = 2, 8
    k_x, k_sol, k_p = jax.random.split(key, 3)

    x = jax.random.uniform(k_x, (bs, gs, NODE_DIM), jnp.float32)

    # solutions as a next-node linked list of a random tour (cycle over all nodes)
    orders = jnp.stack([jax.random.permutation(jax.random.fold_in(k_sol, b), gs)
                        for b in range(bs)]).astype(jnp.int32)
    solutions = jnp.zeros_like(orders)
    solutions = solutions.at[jnp.arange(bs)[:, None], orders].set(
        jnp.roll(orders, -1, axis=1))

    exchange = jnp.zeros((bs, 2), jnp.int32)

    params = init_params(k_p)
    pair, sel_ll = attention_model_forward(params, x, solutions, exchange)
    jax.block_until_ready((pair, sel_ll))
    assert pair.shape == (bs, 2) and sel_ll.shape == (bs,)
    print("KERNEL_OK")
</pallas_src>

<mosaic_0001>
module attributes {stable_mosaic.version = 11 : i64} {
  func.func @fused_forward_kernel(%arg0: i32, %arg1: memref<2x8x32xf32, #tpu.memory_space<vmem>>, %arg2: memref<2x32x96xbf16, #tpu.memory_space<vmem>>, %arg3: memref<2x32x32xbf16, #tpu.memory_space<vmem>>, %arg4: memref<2x32x32xbf16, #tpu.memory_space<vmem>>, %arg5: memref<2x1x32xf32, #tpu.memory_space<vmem>>, %arg6: memref<2x32x32xbf16, #tpu.memory_space<vmem>>, %arg7: memref<2x1x32xf32, #tpu.memory_space<vmem>>, %arg8: memref<2x32x32xbf16, #tpu.memory_space<vmem>>, %arg9: memref<32x64xbf16, #tpu.memory_space<vmem>>, %arg10: memref<2x1xi32, #tpu.memory_space<vmem>>, %arg11: memref<2x1xf32, #tpu.memory_space<vmem>>) attributes {dimension_semantics = [#tpu.dimension_semantics<parallel>], iteration_bounds = array<i64: 1>, scalar_prefetch = 0 : i64, scratch_operands = 0 : i64, tpu.core_type = #tpu.core_type<tc>, window_params = [{transform_indices = @transform_0, window_bounds = array<i64: 2, 8, 32>}, {pipeline_mode = #tpu.pipeline_mode<synchronous>, transform_indices = @transform_1, window_bounds = array<i64: 2, 32, 96>}, {pipeline_mode = #tpu.pipeline_mode<synchronous>, transform_indices = @transform_2, window_bounds = array<i64: 2, 32, 32>}, {pipeline_mode = #tpu.pipeline_mode<synchronous>, transform_indices = @transform_3, window_bounds = array<i64: 2, 32, 32>}, {pipeline_mode = #tpu.pipeline_mode<synchronous>, transform_indices = @transform_4, window_bounds = array<i64: 2, 1, 32>}, {pipeline_mode = #tpu.pipeline_mode<synchronous>, transform_indices = @transform_5, window_bounds = array<i64: 2, 32, 32>}, {pipeline_mode = #tpu.pipeline_mode<synchronous>, transform_indices = @transform_6, window_bounds = array<i64: 2, 1, 32>}, {pipeline_mode = #tpu.pipeline_mode<synchronous>, transform_indices = @transform_7, window_bounds = array<i64: 2, 32, 32>}, {pipeline_mode = #tpu.pipeline_mode<synchronous>, transform_indices = @transform_8, window_bounds = array<i64: 32, 64>}, {transform_indices = @transform_9, window_bounds = array<i64: 2, 1>}, {transform_indices = @transform_10, window_bounds = array<i64: 2, 1>}]} {
    %c0 = arith.constant 0 : index
    %c0_0 = arith.constant 0 : index
    %c0_1 = arith.constant 0 : index
    %0 = vector.load %arg1[%c0, %c0_0, %c0_1] : memref<2x8x32xf32, #tpu.memory_space<vmem>>, vector<2x8x32xf32>
    %1 = vector.shape_cast %0 : vector<2x8x32xf32> to vector<16x32xf32>
    %c0_2 = arith.constant 0 : index
    %c0_3 = arith.constant 0 : index
    %c0_4 = arith.constant 0 : index
    %2 = vector.load %arg2[%c0_2, %c0_3, %c0_4] : memref<2x32x96xbf16, #tpu.memory_space<vmem>>, vector<1x32x96xbf16>
    %3 = vector.shape_cast %2 : vector<1x32x96xbf16> to vector<32x96xbf16>
    %4 = arith.truncf %1 : vector<16x32xf32> to vector<16x32xbf16>
    %cst = arith.constant dense<0.000000e+00> : vector<16x96xf32>
    %5 = tpu.matmul %4, %3, %cst {dimension_numbers = #tpu.dot_dimension_numbers<[1], [0], [0], [1], [0, 0, 1, 1], [], []>} : vector<16x32xbf16>, vector<32x96xbf16>, vector<16x96xf32> -> vector<16x96xf32>
    %6 = vector.shape_cast %5 : vector<16x96xf32> to vector<2x8x96xf32>
    %7 = vector.extract_strided_slice %6 {offsets = [0, 0, 0], sizes = [2, 8, 8], strides = [1, 1, 1]} : vector<2x8x96xf32> to vector<2x8x8xf32>
    %8 = vector.extract_strided_slice %6 {offsets = [0, 0, 32], sizes = [2, 8, 8], strides = [1, 1, 1]} : vector<2x8x96xf32> to vector<2x8x8xf32>
    %9 = vector.extract_strided_slice %6 {offsets = [0, 0, 64], sizes = [2, 8, 8], strides = [1, 1, 1]} : vector<2x8x96xf32> to vector<2x8x8xf32>
    %10 = vector.extract_strided_slice %6 {offsets = [0, 0, 8], sizes = [2, 8, 8], strides = [1, 1, 1]} : vector<2x8x96xf32> to vector<2x8x8xf32>
    %11 = vector.extract_strided_slice %6 {offsets = [0, 0, 40], sizes = [2, 8, 8], strides = [1, 1, 1]} : vector<2x8x96xf32> to vector<2x8x8xf32>
    %12 = vector.extract_strided_slice %6 {offsets = [0, 0, 72], sizes = [2, 8, 8], strides = [1, 1, 1]} : vector<2x8x96xf32> to vector<2x8x8xf32>
    %13 = vector.extract_strided_slice %6 {offsets = [0, 0, 16], sizes = [2, 8, 8], strides = [1, 1, 1]} : vector<2x8x96xf32> to vector<2x8x8xf32>
    %14 = vector.extract_strided_slice %6 {offsets = [0, 0, 48], sizes = [2, 8, 8], strides = [1, 1, 1]} : vector<2x8x96xf32> to vector<2x8x8xf32>
    %15 = vector.extract_strided_slice %6 {offsets = [0, 0, 80], sizes = [2, 8, 8], strides = [1, 1, 1]} : vector<2x8x96xf32> to vector<2x8x8xf32>
    %16 = vector.extract_strided_slice %6 {offsets = [0, 0, 24], sizes = [2, 8, 8], strides = [1, 1, 1]} : vector<2x8x96xf32> to vector<2x8x8xf32>
    %17 = vector.extract_strided_slice %6 {offsets = [0, 0, 56], sizes = [2, 8, 8], strides = [1, 1, 1]} : vector<2x8x96xf32> to vector<2x8x8xf32>
    %18 = vector.extract_strided_slice %6 {offsets = [0, 0, 88], sizes = [2, 8, 8], strides = [1, 1, 1]} : vector<2x8x96xf32> to vector<2x8x8xf32>
    %19 = tpu.concatenate %7, %10, %13, %16 in 0 : vector<2x8x8xf32>, vector<2x8x8xf32>, vector<2x8x8xf32>, vector<2x8x8xf32> -> vector<8x8x8xf32>
    %20 = tpu.concatenate %8, %11, %14, %17 in 0 : vector<2x8x8xf32>, vector<2x8x8xf32>, vector<2x8x8xf32>, vector<2x8x8xf32> -> vector<8x8x8xf32>
    %21 = tpu.concatenate %9, %12, %15, %18 in 0 : vector<2x8x8xf32>, vector<2x8x8xf32>, vector<2x8x8xf32>, vector<2x8x8xf32> -> vector<8x8x8xf32>
    "tpu.trace_start"() <{level = 10 : i32, message = "bqd,bkd->bqk"}> : () -> ()
    %cst_5 = arith.constant dense<0.000000e+00> : vector<8x8x8xf32>
    %22 = tpu.matmul %19, %20, %cst_5 {dimension_numbers = #tpu.dot_dimension_numbers<[2], [2], [1], [1], [0, 0, 0, 1, 1, 1], [0], [0]>} : vector<8x8x8xf32>, vector<8x8x8xf32>, vector<8x8x8xf32> -> vector<8x8x8xf32>
    "tpu.trace_stop"() : () -> ()
    %cst_6 = arith.constant 0.353553385 : f32
    %23 = vector.broadcast %cst_6 : f32 to vector<8x8x8xf32>
    %24 = arith.mulf %22, %23 : vector<8x8x8xf32>
    %cst_7 = arith.constant dense<0xFF800000> : vector<8x8xf32>
    %25 = vector.multi_reduction <maximumf>, %24, %cst_7 [2] : vector<8x8x8xf32> to vector<8x8xf32>
    %26 = vector.shape_cast %25 : vector<8x8xf32> to vector<8x8x1xf32>
    %27 = vector.broadcast %26 : vector<8x8x1xf32> to vector<8x8x8xf32>
    %28 = arith.subf %24, %27 : vector<8x8x8xf32>
    %29 = math.exp %28 : vector<8x8x8xf32>
    %cst_8 = arith.constant dense<0.000000e+00> : vector<8x8xf32>
    %30 = vector.multi_reduction <add>, %29, %cst_8 [2] : vector<8x8x8xf32> to vector<8x8xf32>
    %31 = vector.shape_cast %30 : vector<8x8xf32> to vector<8x8x1xf32>
    %32 = tpu.reciprocal %31 {approx = true} : vector<8x8x1xf32> -> vector<8x8x1xf32>
    %33 = vector.broadcast %32 : vector<8x8x1xf32> to vector<8x8x8xf32>
    %34 = arith.mulf %29, %33 : vector<8x8x8xf32>
    "tpu.trace_start"() <{level = 10 : i32, message = "bqk,bkd->bqd"}> : () -> ()
    %cst_9 = arith.constant dense<0.000000e+00> : vector<8x8x8xf32>
    %35 = tpu.matmul %34, %21, %cst_9 {dimension_numbers = #tpu.dot_dimension_numbers<[2], [1], [1], [2], [0, 0, 0, 1, 1, 2], [0], [0]>} : vector<8x8x8xf32>, vector<8x8x8xf32>, vector<8x8x8xf32> -> vector<8x8x8xf32>
    "tpu.trace_stop"() : () -> ()
    %36 = vector.extract_strided_slice %35 {offsets = [0, 0, 0], sizes = [2, 8, 8], strides = [1, 1, 1]} : vector<8x8x8xf32> to vector<2x8x8xf32>
    %37 = vector.extract_strided_slice %35 {offsets = [2, 0, 0], sizes = [2, 8, 8], strides = [1, 1, 1]} : vector<8x8x8xf32> to vector<2x8x8xf32>
    %38 = vector.extract_strided_slice %35 {offsets = [4, 0, 0], sizes = [2, 8, 8], strides = [1, 1, 1]} : vector<8x8x8xf32> to vector<2x8x8xf32>
    %39 = vector.extract_strided_slice %35 {offsets = [6, 0, 0], sizes = [2, 8, 8], strides = [1, 1, 1]} : vector<8x8x8xf32> to vector<2x8x8xf32>
    %40 = tpu.concatenate %36, %37, %38, %39 in 2 : vector<2x8x8xf32>, vector<2x8x8xf32>, vector<2x8x8xf32>, vector<2x8x8xf32> -> vector<2x8x32xf32>
    %41 = vector.shape_cast %40 : vector<2x8x32xf32> to vector<16x32xf32>
    %c0_10 = arith.constant 0 : index
    %c0_11 = arith.constant 0 : index
    %c0_12 = arith.constant 0 : index
    %42 = vector.load %arg3[%c0_10, %c0_11, %c0_12] : memref<2x32x32xbf16, #tpu.memory_space<vmem>>, vector<1x32x32xbf16>
    %43 = vector.shape_cast %42 : vector<1x32x32xbf16> to vector<32x32xbf16>
    %44 = arith.truncf %41 : vector<16x32xf32> to vector<16x32xbf16>
    %cst_13 = arith.constant dense<0.000000e+00> : vector<16x32xf32>
    %45 = tpu.matmul %44, %43, %cst_13 {dimension_numbers = #tpu.dot_dimension_numbers<[1], [0], [0], [1], [0, 0, 1, 1], [], []>} : vector<16x32xbf16>, vector<32x32xbf16>, vector<16x32xf32> -> vector<16x32xf32>
    %46 = arith.addf %1, %45 : vector<16x32xf32>
    %cst_14 = arith.constant dense<0.000000e+00> : vector<16xf32>
    %47 = vector.multi_reduction <add>, %46, %cst_14 [1] : vector<16x32xf32> to vector<16xf32>
    %48 = vector.shape_cast %47 : vector<16xf32> to vector<16x1xf32>
    %cst_15 = arith.constant 3.200000e+01 : f32
    %49 = vector.broadcast %cst_15 : f32 to vector<16x1xf32>
    %50 = arith.divf %48, %49 : vector<16x1xf32>
    %51 = vector.broadcast %50 : vector<16x1xf32> to vector<16x32xf32>
    %52 = arith.subf %46, %51 : vector<16x32xf32>
    %53 = arith.mulf %52, %52 : vector<16x32xf32>
    %cst_16 = arith.constant dense<0.000000e+00> : vector<16xf32>
    %54 = vector.multi_reduction <add>, %53, %cst_16 [1] : vector<16x32xf32> to vector<16xf32>
    %55 = vector.shape_cast %54 : vector<16xf32> to vector<16x1xf32>
    %cst_17 = arith.constant 3.200000e+01 : f32
    %56 = vector.broadcast %cst_17 : f32 to vector<16x1xf32>
    %57 = arith.divf %55, %56 : vector<16x1xf32>
    %58 = vector.broadcast %50 : vector<16x1xf32> to vector<16x32xf32>
    %59 = arith.subf %46, %58 : vector<16x32xf32>
    %cst_18 = arith.constant 9.99999974E-6 : f32
    %60 = vector.broadcast %cst_18 : f32 to vector<16x1xf32>
    %61 = arith.addf %57, %60 : vector<16x1xf32>
    %62 = math.rsqrt %61 : vector<16x1xf32>
    %63 = vector.broadcast %62 : vector<16x1xf32> to vector<16x32xf32>
    %64 = arith.mulf %59, %63 : vector<16x32xf32>
    %c0_19 = arith.constant 0 : index
    %c0_20 = arith.constant 0 : index
    %c0_21 = arith.constant 0 : index
    %65 = vector.load %arg4[%c0_19, %c0_20, %c0_21] : memref<2x32x32xbf16, #tpu.memory_space<vmem>>, vector<1x32x32xbf16>
    %66 = vector.shape_cast %65 : vector<1x32x32xbf16> to vector<32x32xbf16>
    %67 = arith.truncf %64 : vector<16x32xf32> to vector<16x32xbf16>
    %cst_22 = arith.constant dense<0.000000e+00> : vector<16x32xf32>
    %68 = tpu.matmul %67, %66, %cst_22 {dimension_numbers = #tpu.dot_dimension_numbers<[1], [0], [0], [1], [0, 0, 1, 1], [], []>} : vector<16x32xbf16>, vector<32x32xbf16>, vector<16x32xf32> -> vector<16x32xf32>
    %c0_23 = arith.constant 0 : index
    %c0_24 = arith.constant 0 : index
    %c0_25 = arith.constant 0 : index
    %69 = vector.load %arg5[%c0_23, %c0_24, %c0_25] : memref<2x1x32xf32, #tpu.memory_space<vmem>>, vector<1x1x32xf32>
    %70 = vector.shape_cast %69 : vector<1x1x32xf32> to vector<1x32xf32>
    %71 = vector.broadcast %70 : vector<1x32xf32> to vector<16x32xf32>
    %72 = arith.addf %68, %71 : vector<16x32xf32>
    %cst_26 = arith.constant 0.000000e+00 : f32
    %73 = vector.broadcast %cst_26 : f32 to vector<16x32xf32>
    %74 = arith.maximumf %72, %73 : vector<16x32xf32>
    %c0_27 = arith.constant 0 : index
    %c0_28 = arith.constant 0 : index
    %c0_29 = arith.constant 0 : index
    %75 = vector.load %arg6[%c0_27, %c0_28, %c0_29] : memref<2x32x32xbf16, #tpu.memory_space<vmem>>, vector<1x32x32xbf16>
    %76 = vector.shape_cast %75 : vector<1x32x32xbf16> to vector<32x32xbf16>
    %77 = arith.truncf %74 : vector<16x32xf32> to vector<16x32xbf16>
    %cst_30 = arith.constant dense<0.000000e+00> : vector<16x32xf32>
    %78 = tpu.matmul %77, %76, %cst_30 {dimension_numbers = #tpu.dot_dimension_numbers<[1], [0], [0], [1], [0, 0, 1, 1], [], []>} : vector<16x32xbf16>, vector<32x32xbf16>, vector<16x32xf32> -> vector<16x32xf32>
    %c0_31 = arith.constant 0 : index
    %c0_32 = arith.constant 0 : index
    %c0_33 = arith.constant 0 : index
    %79 = vector.load %arg7[%c0_31, %c0_32, %c0_33] : memref<2x1x32xf32, #tpu.memory_space<vmem>>, vector<1x1x32xf32>
    %80 = vector.shape_cast %79 : vector<1x1x32xf32> to vector<1x32xf32>
    %81 = vector.broadcast %80 : vector<1x32xf32> to vector<16x32xf32>
    %82 = arith.addf %78, %81 : vector<16x32xf32>
    %83 = arith.addf %64, %82 : vector<16x32xf32>
    %cst_34 = arith.constant dense<0.000000e+00> : vector<16xf32>
    %84 = vector.multi_reduction <add>, %83, %cst_34 [1] : vector<16x32xf32> to vector<16xf32>
    %85 = vector.shape_cast %84 : vector<16xf32> to vector<16x1xf32>
    %cst_35 = arith.constant 3.200000e+01 : f32
    %86 = vector.broadcast %cst_35 : f32 to vector<16x1xf32>
    %87 = arith.divf %85, %86 : vector<16x1xf32>
    %88 = vector.broadcast %87 : vector<16x1xf32> to vector<16x32xf32>
    %89 = arith.subf %83, %88 : vector<16x32xf32>
    %90 = arith.mulf %89, %89 : vector<16x32xf32>
    %cst_36 = arith.constant dense<0.000000e+00> : vector<16xf32>
    %91 = vector.multi_reduction <add>, %90, %cst_36 [1] : vector<16x32xf32> to vector<16xf32>
    %92 = vector.shape_cast %91 : vector<16xf32> to vector<16x1xf32>
    %cst_37 = arith.constant 3.200000e+01 : f32
    %93 = vector.broadcast %cst_37 : f32 to vector<16x1xf32>
    %94 = arith.divf %92, %93 : vector<16x1xf32>
    %95 = vector.broadcast %87 : vector<16x1xf32> to vector<16x32xf32>
    %96 = arith.subf %83, %95 : vector<16x32xf32>
    %cst_38 = arith.constant 9.99999974E-6 : f32
    %97 = vector.broadcast %cst_38 : f32 to vector<16x1xf32>
    %98 = arith.addf %94, %97 : vector<16x1xf32>
    %99 = math.rsqrt %98 : vector<16x1xf32>
    %100 = vector.broadcast %99 : vector<16x1xf32> to vector<16x32xf32>
    %101 = arith.mulf %96, %100 : vector<16x32xf32>
    %c1 = arith.constant 1 : index
    %c0_39 = arith.constant 0 : index
    %c0_40 = arith.constant 0 : index
    %102 = vector.load %arg2[%c1, %c0_39, %c0_40] : memref<2x32x96xbf16, #tpu.memory_space<vmem>>, vector<1x32x96xbf16>
    %103 = vector.shape_cast %102 : vector<1x32x96xbf16> to vector<32x96xbf16>
    %104 = arith.truncf %101 : vector<16x32xf32> to vector<16x32xbf16>
    %cst_41 = arith.constant dense<0.000000e+00> : vector<16x96xf32>
    %105 = tpu.matmul %104, %103, %cst_41 {dimension_numbers = #tpu.dot_dimension_numbers<[1], [0], [0], [1], [0, 0, 1, 1], [], []>} : vector<16x32xbf16>, vector<32x96xbf16>, vector<16x96xf32> -> vector<16x96xf32>
    %106 = vector.shape_cast %105 : vector<16x96xf32> to vector<2x8x96xf32>
    %107 = vector.extract_strided_slice %106 {offsets = [0, 0, 0], sizes = [2, 8, 8], strides = [1, 1, 1]} : vector<2x8x96xf32> to vector<2x8x8xf32>
    %108 = vector.extract_strided_slice %106 {offsets = [0, 0, 32], sizes = [2, 8, 8], strides = [1, 1, 1]} : vector<2x8x96xf32> to vector<2x8x8xf32>
    %109 = vector.extract_strided_slice %106 {offsets = [0, 0, 64], sizes = [2, 8, 8], strides = [1, 1, 1]} : vector<2x8x96xf32> to vector<2x8x8xf32>
    %110 = vector.extract_strided_slice %106 {offsets = [0, 0, 8], sizes = [2, 8, 8], strides = [1, 1, 1]} : vector<2x8x96xf32> to vector<2x8x8xf32>
    %111 = vector.extract_strided_slice %106 {offsets = [0, 0, 40], sizes = [2, 8, 8], strides = [1, 1, 1]} : vector<2x8x96xf32> to vector<2x8x8xf32>
    %112 = vector.extract_strided_slice %106 {offsets = [0, 0, 72], sizes = [2, 8, 8], strides = [1, 1, 1]} : vector<2x8x96xf32> to vector<2x8x8xf32>
    %113 = vector.extract_strided_slice %106 {offsets = [0, 0, 16], sizes = [2, 8, 8], strides = [1, 1, 1]} : vector<2x8x96xf32> to vector<2x8x8xf32>
    %114 = vector.extract_strided_slice %106 {offsets = [0, 0, 48], sizes = [2, 8, 8], strides = [1, 1, 1]} : vector<2x8x96xf32> to vector<2x8x8xf32>
    %115 = vector.extract_strided_slice %106 {offsets = [0, 0, 80], sizes = [2, 8, 8], strides = [1, 1, 1]} : vector<2x8x96xf32> to vector<2x8x8xf32>
    %116 = vector.extract_strided_slice %106 {offsets = [0, 0, 24], sizes = [2, 8, 8], strides = [1, 1, 1]} : vector<2x8x96xf32> to vector<2x8x8xf32>
    %117 = vector.extract_strided_slice %106 {offsets = [0, 0, 56], sizes = [2, 8, 8], strides = [1, 1, 1]} : vector<2x8x96xf32> to vector<2x8x8xf32>
    %118 = vector.extract_strided_slice %106 {offsets = [0, 0, 88], sizes = [2, 8, 8], strides = [1, 1, 1]} : vector<2x8x96xf32> to vector<2x8x8xf32>
    %119 = tpu.concatenate %107, %110, %113, %116 in 0 : vector<2x8x8xf32>, vector<2x8x8xf32>, vector<2x8x8xf32>, vector<2x8x8xf32> -> vector<8x8x8xf32>
    %120 = tpu.concatenate %108, %111, %114, %117 in 0 : vector<2x8x8xf32>, vector<2x8x8xf32>, vector<2x8x8xf32>, vector<2x8x8xf32> -> vector<8x8x8xf32>
    %121 = tpu.concatenate %109, %112, %115, %118 in 0 : vector<2x8x8xf32>, vector<2x8x8xf32>, vector<2x8x8xf32>, vector<2x8x8xf32> -> vector<8x8x8xf32>
    "tpu.trace_start"() <{level = 10 : i32, message = "bqd,bkd->bqk"}> : () -> ()
    %cst_42 = arith.constant dense<0.000000e+00> : vector<8x8x8xf32>
    %122 = tpu.matmul %119, %120, %cst_42 {dimension_numbers = #tpu.dot_dimension_numbers<[2], [2], [1], [1], [0, 0, 0, 1, 1, 1], [0], [0]>} : vector<8x8x8xf32>, vector<8x8x8xf32>, vector<8x8x8xf32> -> vector<8x8x8xf32>
    "tpu.trace_stop"() : () -> ()
    %cst_43 = arith.constant 0.353553385 : f32
    %123 = vector.broadcast %cst_43 : f32 to vector<8x8x8xf32>
    %124 = arith.mulf %122, %123 : vector<8x8x8xf32>
    %cst_44 = arith.constant dense<0xFF800000> : vector<8x8xf32>
    %125 = vector.multi_reduction <maximumf>, %124, %cst_44 [2] : vector<8x8x8xf32> to vector<8x8xf32>
    %126 = vector.shape_cast %125 : vector<8x8xf32> to vector<8x8x1xf32>
    %127 = vector.broadcast %126 : vector<8x8x1xf32> to vector<8x8x8xf32>
    %128 = arith.subf %124, %127 : vector<8x8x8xf32>
    %129 = math.exp %128 : vector<8x8x8xf32>
    %cst_45 = arith.constant dense<0.000000e+00> : vector<8x8xf32>
    %130 = vector.multi_reduction <add>, %129, %cst_45 [2] : vector<8x8x8xf32> to vector<8x8xf32>
    %131 = vector.shape_cast %130 : vector<8x8xf32> to vector<8x8x1xf32>
    %132 = tpu.reciprocal %131 {approx = true} : vector<8x8x1xf32> -> vector<8x8x1xf32>
    %133 = vector.broadcast %132 : vector<8x8x1xf32> to vector<8x8x8xf32>
    %134 = arith.mulf %129, %133 : vector<8x8x8xf32>
    "tpu.trace_start"() <{level = 10 : i32, message = "bqk,bkd->bqd"}> : () -> ()
    %cst_46 = arith.constant dense<0.000000e+00> : vector<8x8x8xf32>
    %135 = tpu.matmul %134, %121, %cst_46 {dimension_numbers = #tpu.dot_dimension_numbers<[2], [1], [1], [2], [0, 0, 0, 1, 1, 2], [0], [0]>} : vector<8x8x8xf32>, vector<8x8x8xf32>, vector<8x8x8xf32> -> vector<8x8x8xf32>
    "tpu.trace_stop"() : () -> ()
    %136 = vector.extract_strided_slice %135 {offsets = [0, 0, 0], sizes = [2, 8, 8], strides = [1, 1, 1]} : vector<8x8x8xf32> to vector<2x8x8xf32>
    %137 = vector.extract_strided_slice %135 {offsets = [2, 0, 0], sizes = [2, 8, 8], strides = [1, 1, 1]} : vector<8x8x8xf32> to vector<2x8x8xf32>
    %138 = vector.extract_strided_slice %135 {offsets = [4, 0, 0], sizes = [2, 8, 8], strides = [1, 1, 1]} : vector<8x8x8xf32> to vector<2x8x8xf32>
    %139 = vector.extract_strided_slice %135 {offsets = [6, 0, 0], sizes = [2, 8, 8], strides = [1, 1, 1]} : vector<8x8x8xf32> to vector<2x8x8xf32>
    %140 = tpu.concatenate %136, %137, %138, %139 in 2 : vector<2x8x8xf32>, vector<2x8x8xf32>, vector<2x8x8xf32>, vector<2x8x8xf32> -> vector<2x8x32xf32>
    %141 = vector.shape_cast %140 : vector<2x8x32xf32> to vector<16x32xf32>
    %c1_47 = arith.constant 1 : index
    %c0_48 = arith.constant 0 : index
    %c0_49 = arith.constant 0 : index
    %142 = vector.load %arg3[%c1_47, %c0_48, %c0_49] : memref<2x32x32xbf16, #tpu.memory_space<vmem>>, vector<1x32x32xbf16>
    %143 = vector.shape_cast %142 : vector<1x32x32xbf16> to vector<32x32xbf16>
    %144 = arith.truncf %141 : vector<16x32xf32> to vector<16x32xbf16>
    %cst_50 = arith.constant dense<0.000000e+00> : vector<16x32xf32>
    %145 = tpu.matmul %144, %143, %cst_50 {dimension_numbers = #tpu.dot_dimension_numbers<[1], [0], [0], [1], [0, 0, 1, 1], [], []>} : vector<16x32xbf16>, vector<32x32xbf16>, vector<16x32xf32> -> vector<16x32xf32>
    %146 = arith.addf %101, %145 : vector<16x32xf32>
    %cst_51 = arith.constant dense<0.000000e+00> : vector<16xf32>
    %147 = vector.multi_reduction <add>, %146, %cst_51 [1] : vector<16x32xf32> to vector<16xf32>
    %148 = vector.shape_cast %147 : vector<16xf32> to vector<16x1xf32>
    %cst_52 = arith.constant 3.200000e+01 : f32
    %149 = vector.broadcast %cst_52 : f32 to vector<16x1xf32>
    %150 = arith.divf %148, %149 : vector<16x1xf32>
    %151 = vector.broadcast %150 : vector<16x1xf32> to vector<16x32xf32>
    %152 = arith.subf %146, %151 : vector<16x32xf32>
    %153 = arith.mulf %152, %152 : vector<16x32xf32>
    %cst_53 = arith.constant dense<0.000000e+00> : vector<16xf32>
    %154 = vector.multi_reduction <add>, %153, %cst_53 [1] : vector<16x32xf32> to vector<16xf32>
    %155 = vector.shape_cast %154 : vector<16xf32> to vector<16x1xf32>
    %cst_54 = arith.constant 3.200000e+01 : f32
    %156 = vector.broadcast %cst_54 : f32 to vector<16x1xf32>
    %157 = arith.divf %155, %156 : vector<16x1xf32>
    %158 = vector.broadcast %150 : vector<16x1xf32> to vector<16x32xf32>
    %159 = arith.subf %146, %158 : vector<16x32xf32>
    %cst_55 = arith.constant 9.99999974E-6 : f32
    %160 = vector.broadcast %cst_55 : f32 to vector<16x1xf32>
    %161 = arith.addf %157, %160 : vector<16x1xf32>
    %162 = math.rsqrt %161 : vector<16x1xf32>
    %163 = vector.broadcast %162 : vector<16x1xf32> to vector<16x32xf32>
    %164 = arith.mulf %159, %163 : vector<16x32xf32>
    %c1_56 = arith.constant 1 : index
    %c0_57 = arith.constant 0 : index
    %c0_58 = arith.constant 0 : index
    %165 = vector.load %arg4[%c1_56, %c0_57, %c0_58] : memref<2x32x32xbf16, #tpu.memory_space<vmem>>, vector<1x32x32xbf16>
    %166 = vector.shape_cast %165 : vector<1x32x32xbf16> to vector<32x32xbf16>
    %167 = arith.truncf %164 : vector<16x32xf32> to vector<16x32xbf16>
    %cst_59 = arith.constant dense<0.000000e+00> : vector<16x32xf32>
    %168 = tpu.matmul %167, %166, %cst_59 {dimension_numbers = #tpu.dot_dimension_numbers<[1], [0], [0], [1], [0, 0, 1, 1], [], []>} : vector<16x32xbf16>, vector<32x32xbf16>, vector<16x32xf32> -> vector<16x32xf32>
    %c1_60 = arith.constant 1 : index
    %c0_61 = arith.constant 0 : index
    %c0_62 = arith.constant 0 : index
    %169 = vector.load %arg5[%c1_60, %c0_61, %c0_62] : memref<2x1x32xf32, #tpu.memory_space<vmem>>, vector<1x1x32xf32>
    %170 = vector.shape_cast %169 : vector<1x1x32xf32> to vector<1x32xf32>
    %171 = vector.broadcast %170 : vector<1x32xf32> to vector<16x32xf32>
    %172 = arith.addf %168, %171 : vector<16x32xf32>
    %cst_63 = arith.constant 0.000000e+00 : f32
    %173 = vector.broadcast %cst_63 : f32 to vector<16x32xf32>
    %174 = arith.maximumf %172, %173 : vector<16x32xf32>
    %c1_64 = arith.constant 1 : index
    %c0_65 = arith.constant 0 : index
    %c0_66 = arith.constant 0 : index
    %175 = vector.load %arg6[%c1_64, %c0_65, %c0_66] : memref<2x32x32xbf16, #tpu.memory_space<vmem>>, vector<1x32x32xbf16>
    %176 = vector.shape_cast %175 : vector<1x32x32xbf16> to vector<32x32xbf16>
    %177 = arith.truncf %174 : vector<16x32xf32> to vector<16x32xbf16>
    %cst_67 = arith.constant dense<0.000000e+00> : vector<16x32xf32>
    %178 = tpu.matmul %177, %176, %cst_67 {dimension_numbers = #tpu.dot_dimension_numbers<[1], [0], [0], [1], [0, 0, 1, 1], [], []>} : vector<16x32xbf16>, vector<32x32xbf16>, vector<16x32xf32> -> vector<16x32xf32>
    %c1_68 = arith.constant 1 : index
    %c0_69 = arith.constant 0 : index
    %c0_70 = arith.constant 0 : index
    %179 = vector.load %arg7[%c1_68, %c0_69, %c0_70] : memref<2x1x32xf32, #tpu.memory_space<vmem>>, vector<1x1x32xf32>
    %180 = vector.shape_cast %179 : vector<1x1x32xf32> to vector<1x32xf32>
    %181 = vector.broadcast %180 : vector<1x32xf32> to vector<16x32xf32>
    %182 = arith.addf %178, %181 : vector<16x32xf32>
    %183 = arith.addf %164, %182 : vector<16x32xf32>
    %cst_71 = arith.constant dense<0.000000e+00> : vector<16xf32>
    %184 = vector.multi_reduction <add>, %183, %cst_71 [1] : vector<16x32xf32> to vector<16xf32>
    %185 = vector.shape_cast %184 : vector<16xf32> to vector<16x1xf32>
    %cst_72 = arith.constant 3.200000e+01 : f32
    %186 = vector.broadcast %cst_72 : f32 to vector<16x1xf32>
    %187 = arith.divf %185, %186 : vector<16x1xf32>
    %188 = vector.broadcast %187 : vector<16x1xf32> to vector<16x32xf32>
    %189 = arith.subf %183, %188 : vector<16x32xf32>
    %190 = arith.mulf %189, %189 : vector<16x32xf32>
    %cst_73 = arith.constant dense<0.000000e+00> : vector<16xf32>
    %191 = vector.multi_reduction <add>, %190, %cst_73 [1] : vector<16x32xf32> to vector<16xf32>
    %192 = vector.shape_cast %191 : vector<16xf32> to vector<16x1xf32>
    %cst_74 = arith.constant 3.200000e+01 : f32
    %193 = vector.broadcast %cst_74 : f32 to vector<16x1xf32>
    %194 = arith.divf %192, %193 : vector<16x1xf32>
    %195 = vector.broadcast %187 : vector<16x1xf32> to vector<16x32xf32>
    %196 = arith.subf %183, %195 : vector<16x32xf32>
    %cst_75 = arith.constant 9.99999974E-6 : f32
    %197 = vector.broadcast %cst_75 : f32 to vector<16x1xf32>
    %198 = arith.addf %194, %197 : vector<16x1xf32>
    %199 = math.rsqrt %198 : vector<16x1xf32>
    %200 = vector.broadcast %199 : vector<16x1xf32> to vector<16x32xf32>
    %201 = arith.mulf %196, %200 : vector<16x32xf32>
    %202 = vector.shape_cast %201 : vector<16x32xf32> to vector<2x8x32xf32>
    %cst_76 = arith.constant dense<0xFF800000> : vector<2x32xf32>
    %203 = vector.multi_reduction <maximumf>, %202, %cst_76 [1] : vector<2x8x32xf32> to vector<2x32xf32>
    %c0_77 = arith.constant 0 : index
    %c0_78 = arith.constant 0 : index
    %c0_79 = arith.constant 0 : index
    %204 = vector.load %arg8[%c0_77, %c0_78, %c0_79] : memref<2x32x32xbf16, #tpu.memory_space<vmem>>, vector<1x32x32xbf16>
    %205 = vector.shape_cast %204 : vector<1x32x32xbf16> to vector<32x32xbf16>
    %206 = arith.truncf %203 : vector<2x32xf32> to vector<2x32xbf16>
    %cst_80 = arith.constant dense<0.000000e+00> : vector<2x32xf32>
    %207 = tpu.matmul %206, %205, %cst_80 {dimension_numbers = #tpu.dot_dimension_numbers<[1], [0], [0], [1], [0, 0, 1, 1], [], []>} : vector<2x32xbf16>, vector<32x32xbf16>, vector<2x32xf32> -> vector<2x32xf32>
    %c1_81 = arith.constant 1 : index
    %c0_82 = arith.constant 0 : index
    %c0_83 = arith.constant 0 : index
    %208 = vector.load %arg8[%c1_81, %c0_82, %c0_83] : memref<2x32x32xbf16, #tpu.memory_space<vmem>>, vector<1x32x32xbf16>
    %209 = vector.shape_cast %208 : vector<1x32x32xbf16> to vector<32x32xbf16>
    %210 = arith.truncf %201 : vector<16x32xf32> to vector<16x32xbf16>
    %cst_84 = arith.constant dense<0.000000e+00> : vector<16x32xf32>
    %211 = tpu.matmul %210, %209, %cst_84 {dimension_numbers = #tpu.dot_dimension_numbers<[1], [0], [0], [1], [0, 0, 1, 1], [], []>} : vector<16x32xbf16>, vector<32x32xbf16>, vector<16x32xf32> -> vector<16x32xf32>
    %212 = vector.shape_cast %211 : vector<16x32xf32> to vector<2x8x32xf32>
    %213 = vector.shape_cast %207 : vector<2x32xf32> to vector<2x1x32xf32>
    %214 = vector.broadcast %213 : vector<2x1x32xf32> to vector<2x8x32xf32>
    %215 = arith.addf %212, %214 : vector<2x8x32xf32>
    %216 = vector.shape_cast %215 : vector<2x8x32xf32> to vector<16x32xf32>
    %c0_85 = arith.constant 0 : index
    %c0_86 = arith.constant 0 : index
    %217 = vector.load %arg9[%c0_85, %c0_86] : memref<32x64xbf16, #tpu.memory_space<vmem>>, vector<32x64xbf16>
    %218 = arith.truncf %216 : vector<16x32xf32> to vector<16x32xbf16>
    %cst_87 = arith.constant dense<0.000000e+00> : vector<16x64xf32>
    %219 = tpu.matmul %218, %217, %cst_87 {dimension_numbers = #tpu.dot_dimension_numbers<[1], [0], [0], [1], [0, 0, 1, 1], [], []>} : vector<16x32xbf16>, vector<32x64xbf16>, vector<16x64xf32> -> vector<16x64xf32>
    %220 = vector.extract_strided_slice %219 {offsets = [0, 0], sizes = [16, 32], strides = [1, 1]} : vector<16x64xf32> to vector<16x32xf32>
    %221 = vector.shape_cast %220 : vector<16x32xf32> to vector<2x8x32xf32>
    %222 = vector.extract_strided_slice %219 {offsets = [0, 32], sizes = [16, 32], strides = [1, 1]} : vector<16x64xf32> to vector<16x32xf32>
    %223 = vector.shape_cast %222 : vector<16x32xf32> to vector<2x8x32xf32>
    "tpu.trace_start"() <{level = 10 : i32, message = "bqd,bkd->bqk"}> : () -> ()
    %cst_88 = arith.constant dense<0.000000e+00> : vector<2x8x8xf32>
    %224 = tpu.matmul %221, %223, %cst_88 {dimension_numbers = #tpu.dot_dimension_numbers<[2], [2], [1], [1], [0, 0, 0, 1, 1, 1], [0], [0]>} : vector<2x8x32xf32>, vector<2x8x32xf32>, vector<2x8x8xf32> -> vector<2x8x8xf32>
    "tpu.trace_stop"() : () -> ()
    %cst_89 = arith.constant 0.176776692 : f32
    %225 = vector.broadcast %cst_89 : f32 to vector<2x8x8xf32>
    %226 = arith.mulf %224, %225 : vector<2x8x8xf32>
    %227 = math.tanh %226 : vector<2x8x8xf32>
    %cst_90 = arith.constant 1.000000e+01 : f32
    %228 = vector.broadcast %cst_90 : f32 to vector<2x8x8xf32>
    %229 = arith.mulf %228, %227 : vector<2x8x8xf32>
    %230 = tpu.iota {dimensions = array<i32: 1>} : vector<2x8x8xi32>
    %231 = tpu.iota {dimensions = array<i32: 2>} : vector<2x8x8xi32>
    %232 = arith.cmpi eq, %231, %230 : vector<2x8x8xi32>
    %c8_i32 = arith.constant 8 : i32
    %233 = vector.broadcast %c8_i32 : i32 to vector<2x8x8xi32>
    %234 = arith.cmpi sge, %231, %233 : vector<2x8x8xi32>
    %235 = arith.ori %232, %234 : vector<2x8x8xi1>
    %c8_i32_91 = arith.constant 8 : i32
    %236 = vector.broadcast %c8_i32_91 : i32 to vector<2x8x8xi32>
    %237 = arith.cmpi sge, %230, %236 : vector<2x8x8xi32>
    %238 = arith.ori %235, %237 : vector<2x8x8xi1>
    %cst_92 = arith.constant -1.000000e+09 : f32
    %239 = vector.broadcast %cst_92 : f32 to vector<2x8x8xf32>
    %240 = arith.select %238, %239, %229 : vector<2x8x8xi1>, vector<2x8x8xf32>
    %cst_93 = arith.constant dense<0xFF800000> : vector<2x8xf32>
    %241 = vector.multi_reduction <maximumf>, %240, %cst_93 [2] : vector<2x8x8xf32> to vector<2x8xf32>
    %242 = vector.shape_cast %241 : vector<2x8xf32> to vector<2x8x1xf32>
    %cst_94 = arith.constant dense<0xFF800000> : vector<2x1xf32>
    %243 = vector.multi_reduction <maximumf>, %242, %cst_94 [1] : vector<2x8x1xf32> to vector<2x1xf32>
    %244 = vector.shape_cast %243 : vector<2x1xf32> to vector<2x1x1xf32>
    %245 = vector.broadcast %244 : vector<2x1x1xf32> to vector<2x8x8xf32>
    %246 = arith.subf %240, %245 : vector<2x8x8xf32>
    %247 = math.exp %246 : vector<2x8x8xf32>
    %cst_95 = arith.constant dense<0.000000e+00> : vector<2x8xf32>
    %248 = vector.multi_reduction <add>, %247, %cst_95 [2] : vector<2x8x8xf32> to vector<2x8xf32>
    %249 = vector.shape_cast %248 : vector<2x8xf32> to vector<2x8x1xf32>
    %cst_96 = arith.constant dense<0.000000e+00> : vector<2x1xf32>
    %250 = vector.multi_reduction <add>, %249, %cst_96 [1] : vector<2x8x1xf32> to vector<2x1xf32>
    %251 = vector.shape_cast %250 : vector<2x1xf32> to vector<2x1x1xf32>
    %252 = vector.broadcast %244 : vector<2x1x1xf32> to vector<2x8x8xf32>
    %253 = arith.subf %240, %252 : vector<2x8x8xf32>
    %254 = math.log %251 : vector<2x1x1xf32>
    %255 = vector.broadcast %254 : vector<2x1x1xf32> to vector<2x8x8xf32>
    %256 = arith.subf %253, %255 : vector<2x8x8xf32>
    %cst_97 = arith.constant dense<0xFF800000> : vector<2x8xf32>
    %257 = vector.multi_reduction <maximumf>, %256, %cst_97 [2] : vector<2x8x8xf32> to vector<2x8xf32>
    %258 = vector.shape_cast %257 : vector<2x8xf32> to vector<2x8x1xf32>
    %cst_98 = arith.constant dense<0xFF800000> : vector<2x1xf32>
    %259 = vector.multi_reduction <maximumf>, %258, %cst_98 [1] : vector<2x8x1xf32> to vector<2x1xf32>
    %260 = vector.shape_cast %259 : vector<2x1xf32> to vector<2x1x1xf32>
    %c8_i32_99 = arith.constant 8 : i32
    %261 = vector.broadcast %c8_i32_99 : i32 to vector<2x8x8xi32>
    %262 = arith.muli %230, %261 : vector<2x8x8xi32>
    %263 = arith.addi %262, %231 : vector<2x8x8xi32>
    %264 = arith.sitofp %263 : vector<2x8x8xi32> to vector<2x8x8xf32>
    %265 = vector.broadcast %260 : vector<2x1x1xf32> to vector<2x8x8xf32>
    %266 = arith.cmpf oge, %256, %265 : vector<2x8x8xf32>
    %cst_100 = arith.constant 1.07374182E+9 : f32
    %267 = vector.broadcast %cst_100 : f32 to vector<2x8x8xf32>
    %268 = arith.select %266, %264, %267 : vector<2x8x8xi1>, vector<2x8x8xf32>
    %cst_101 = arith.constant dense<0x7F800000> : vector<2x8xf32>
    %269 = vector.multi_reduction <minimumf>, %268, %cst_101 [2] : vector<2x8x8xf32> to vector<2x8xf32>
    %270 = vector.shape_cast %269 : vector<2x8xf32> to vector<2x8x1xf32>
    %cst_102 = arith.constant dense<0x7F800000> : vector<2x1xf32>
    %271 = vector.multi_reduction <minimumf>, %270, %cst_102 [1] : vector<2x8x1xf32> to vector<2x1xf32>
    %272 = vector.shape_cast %271 : vector<2x1xf32> to vector<2x1x1xf32>
    %273 = vector.shape_cast %272 : vector<2x1x1xf32> to vector<2x1xf32>
    %274 = arith.fptosi %273 : vector<2x1xf32> to vector<2x1xi32>
    %c0_103 = arith.constant 0 : index
    %c0_104 = arith.constant 0 : index
    %275 = vector.load %arg10[%c0_103, %c0_104] : memref<2x1xi32, #tpu.memory_space<vmem>>, vector<2x1xi32>
    tpu.vector_store %arg10[%c0_103, %c0_104], %274 {strides = array<i32>} : memref<2x1xi32, #tpu.memory_space<vmem>>, vector<2x1xi32>,
    %276 = vector.shape_cast %260 : vector<2x1x1xf32> to vector<2x1xf32>
    %c0_105 = arith.constant 0 : index
    %c0_106 = arith.constant 0 : index
    %277 = vector.load %arg11[%c0_105, %c0_106] : memref<2x1xf32, #tpu.memory_space<vmem>>, vector<2x1xf32>
    tpu.vector_store %arg11[%c0_105, %c0_106], %276 {strides = array<i32>} : memref<2x1xf32, #tpu.memory_space<vmem>>, vector<2x1xf32>,
    return
  }
  func.func @transform_0(%arg0: i32) -> (i32, i32, i32) {
    %c0_i32 = arith.constant 0 : i32
    %c0_i32_0 = arith.constant 0 : i32
    %c0_i32_1 = arith.constant 0 : i32
    return %arg0, %c0_i32, %c0_i32_0 : i32, i32, i32
  }
  func.func @transform_1(%arg0: i32) -> (i32, i32, i32) {
    %c0_i32 = arith.constant 0 : i32
    %c0_i32_0 = arith.constant 0 : i32
    %c0_i32_1 = arith.constant 0 : i32
    %c0_i32_2 = arith.constant 0 : i32
    return %c0_i32, %c0_i32_0, %c0_i32_1 : i32, i32, i32
  }
  func.func @transform_2(%arg0: i32) -> (i32, i32, i32) {
    %c0_i32 = arith.constant 0 : i32
    %c0_i32_0 = arith.constant 0 : i32
    %c0_i32_1 = arith.constant 0 : i32
    %c0_i32_2 = arith.constant 0 : i32
    return %c0_i32, %c0_i32_0, %c0_i32_1 : i32, i32, i32
  }
  func.func @transform_3(%arg0: i32) -> (i32, i32, i32) {
    %c0_i32 = arith.constant 0 : i32
    %c0_i32_0 = arith.constant 0 : i32
    %c0_i32_1 = arith.constant 0 : i32
    %c0_i32_2 = arith.constant 0 : i32
    return %c0_i32, %c0_i32_0, %c0_i32_1 : i32, i32, i32
  }
  func.func @transform_4(%arg0: i32) -> (i32, i32, i32) {
    %c0_i32 = arith.constant 0 : i32
    %c0_i32_0 = arith.constant 0 : i32
    %c0_i32_1 = arith.constant 0 : i32
    %c0_i32_2 = arith.constant 0 : i32
    return %c0_i32, %c0_i32_0, %c0_i32_1 : i32, i32, i32
  }
  func.func @transform_5(%arg0: i32) -> (i32, i32, i32) {
    %c0_i32 = arith.constant 0 : i32
    %c0_i32_0 = arith.constant 0 : i32
    %c0_i32_1 = arith.constant 0 : i32
    %c0_i32_2 = arith.constant 0 : i32
    return %c0_i32, %c0_i32_0, %c0_i32_1 : i32, i32, i32
  }
  func.func @transform_6(%arg0: i32) -> (i32, i32, i32) {
    %c0_i32 = arith.constant 0 : i32
    %c0_i32_0 = arith.constant 0 : i32
    %c0_i32_1 = arith.constant 0 : i32
    %c0_i32_2 = arith.constant 0 : i32
    return %c0_i32, %c0_i32_0, %c0_i32_1 : i32, i32, i32
  }
  func.func @transform_7(%arg0: i32) -> (i32, i32, i32) {
    %c0_i32 = arith.constant 0 : i32
    %c0_i32_0 = arith.constant 0 : i32
    %c0_i32_1 = arith.constant 0 : i32
    %c0_i32_2 = arith.constant 0 : i32
    return %c0_i32, %c0_i32_0, %c0_i32_1 : i32, i32, i32
  }
  func.func @transform_8(%arg0: i32) -> (i32, i32) {
    %c0_i32 = arith.constant 0 : i32
    %c0_i32_0 = arith.constant 0 : i32
    %c0_i32_1 = arith.constant 0 : i32
    return %c0_i32, %c0_i32_0 : i32, i32
  }
  func.func @transform_9(%arg0: i32) -> (i32, i32) {
    %c0_i32 = arith.constant 0 : i32
    %c0_i32_0 = arith.constant 0 : i32
    return %arg0, %c0_i32 : i32, i32
  }
  func.func @transform_10(%arg0: i32) -> (i32, i32) {
    %c0_i32 = arith.constant 0 : i32
    %c0_i32_0 = arith.constant 0 : i32
    return %arg0, %c0_i32 : i32, i32
  }
}

</mosaic_0001>

<bundles_post_ra>
// kernel: tpu_custom_call.1
= control target key start
LH: loop header
LB: loop body
LE: loop exit
PB: predicated region body
PF: predicated region fallthrough
CT: control target
= control target key end

     0   :  { %16 = vsyncpa [#allocation3], 0  ;;  %s3102_s0 = inlined_call_operand.hbm [shape: f32[2,8,32], index: 0, kind: input, shape index: {}]   ;;  %s3103_s1 = inlined_call_operand.hbm [shape: bf16[2,32,96], index: 1, kind: input, shape index: {}]   ;;  %s3104_s2 = inlined_call_operand.hbm [shape: bf16[2,32,32], index: 2, kind: input, shape index: {}]   ;;  %s3105_s3 = inlined_call_operand.hbm [shape: bf16[2,32,32], index: 3, kind: input, shape index: {}]   ;;  %s3106_s4 = inlined_call_operand.vmem [shape: f32[2,1,32], index: 4, kind: input, shape index: {}]   ;;  %s3107_s5 = inlined_call_operand.hbm [shape: bf16[2,32,32], index: 5, kind: input, shape index: {}]   ;;  %s3108_s6 = inlined_call_operand.vmem [shape: f32[2,1,32], index: 6, kind: input, shape index: {}]   ;;  %s3109_s7 = inlined_call_operand.hbm [shape: bf16[2,32,32], index: 7, kind: input, shape index: {}]   ;;  %s3110_s8 = inlined_call_operand.hbm [shape: bf16[32,64], index: 8, kind: input, shape index: {}]   ;;  %s3111_s9 = inlined_call_operand.vmem [shape: s32[2,1], index: 9, kind: output, shape index: {0}]   ;;  %s3112_s10 = inlined_call_operand.vmem [shape: f32[2,1], index: 10, kind: output, shape index: {1}]  }
   0x1   :  { %17 = vsyncpa [#allocation5], 0 }
   0x2   :  { %18 = vsyncpa [#allocation8], 0  ;;  %s37_s15 = sshll.u32 %s3103_s1, 4  ;;  %s38_s15 = int_to_ptr.hbm [resolvable:$true] %s37_s15 }
   0x3   :  { %19 = vsyncpa [#allocation11], 0  ;;  %s2614_s16 = smov [#allocation4]   ;;  %s63_s20 = sshll.u32 %s3105_s3, 4  ;;  %s64_s20 = int_to_ptr.hbm [resolvable:$true] %s63_s20 }
   0x4   :  { %s39_s17 = sshll.u32 %s2614_s16, 4  ;;  %s2615_s21 = smov 64   ;;  %s40_s17 = int_to_ptr.vmem [resolvable:$true] %s39_s17 }
   0x5   :  { %s2616_s22 = smov 4   ;;  %s2617_s23 = smov [#allocation7]  }
   0x6   :  { %45 = dma.hbm_to_vmem [thread:$0]  %s38_s15, 512, %s40_s17, [#allocation5], %s2615_s21, %s2615_s21, %s2616_s22  }
   0x7   :  { %s65_s24 = sshll.u32 %s2617_s23, 4  ;;  %s93_s26 = sshll.u32 %s3109_s7, 4  ;;  %s66_s24 = int_to_ptr.vmem [resolvable:$true] %s65_s24  ;;  %s94_s26 = int_to_ptr.hbm [resolvable:$true] %s93_s26 }
   0x8   :  { %71 = dma.hbm_to_vmem [thread:$0]  %s64_s20, 512, %s66_s24, [#allocation8], %s2615_s21, %s2615_s21, %s2616_s22  }
   0x9   :  { %s24_s28 = sshll.u32 %s3102_s0, 4  ;;  %s2618_s29 = smov [#allocation10]   ;;  %s25_s28 = int_to_ptr.hbm [resolvable:$true] %s24_s28 }
   0xa   :  { %s95_s30 = sshll.u32 %s2618_s29, 4  ;;  %s2619_s11 = smov [#allocation2]   ;;  %s96_s30 = int_to_ptr.vmem [resolvable:$true] %s95_s30 }
   0xb   :  { %101 = dma.hbm_to_vmem [thread:$0]  %s94_s26, 512, %s96_s30, [#allocation11], %s2615_s21, %s2615_s21, %s2616_s22  }
   0xc   :  { %s26_s7 = sshll.u32 %s2619_s11, 4  ;;  %s2620_s12 = smov 128   ;;  %s27_s7 = int_to_ptr.vmem [resolvable:$true] %s26_s7 }
   0xd   :  { %s2621_s13 = smov 8   ;;  %s50_s16 = sshll.u32 %s3104_s2, 4  ;;  %s51_s16 = int_to_ptr.hbm [resolvable:$true] %s50_s16 }
   0xe   :  { %32 = dma.hbm_to_vmem [thread:$0]  %s25_s28, 256, %s27_s7, [#allocation3], %s2620_s12, %s2620_s12, %s2621_s13  }
   0xf   :  { %s2622_s0 = smov [#allocation6]   ;;  %s78_s20 = sshll.u32 %s3107_s5, 4  ;;  %s79_s20 = int_to_ptr.hbm [resolvable:$true] %s78_s20 }
  0x10   :  { %s52_s17 = sshll.u32 %s2622_s0, 4  ;;  %s2623_s23 = smov [#allocation9]   ;;  %s53_s17 = int_to_ptr.vmem [resolvable:$true] %s52_s17 }
  0x11   :  { %58 = dma.hbm_to_vmem [thread:$0]  %s51_s16, 512, %s53_s17, [#allocation5], %s2615_s21, %s2615_s21, %s2616_s22  }
  0x12   :  { %s80_s24 = sshll.u32 %s2623_s23, 4  ;;  %s106_s26 = sshll.u32 %s3110_s8, 4  ;;  %s81_s24 = int_to_ptr.vmem [resolvable:$true] %s80_s24  ;;  %s107_s26 = int_to_ptr.hbm [resolvable:$true] %s106_s26 }
  0x13   :  { %86 = dma.hbm_to_vmem [thread:$0]  %s79_s20, 512, %s81_s24, [#allocation8], %s2615_s21, %s2615_s21, %s2616_s22  }
  0x14   :  { %s2624_s2 = smov [#allocation12]  }
  0x15   :  { %s108_s3 = sshll.u32 %s2624_s2, 4  ;;  %s109_s3 = int_to_ptr.vmem [resolvable:$true] %s108_s3 }
  0x16   :  { %114 = dma.hbm_to_vmem [thread:$0]  %s107_s26, 256, %s109_s3, [#allocation11], %s2615_s21, %s2615_s21, %s2616_s22  }
  0x17   :  { %2606 = dma.done.wait [#allocation3], 256  }
  0x18   :  { %2607 = vsyncadd [#allocation3], 4294967040 }
  0x19   :  { %2608 = dma.done.wait [#allocation5], 1024  }
  0x1a   :  { %2609 = vsyncadd [#allocation5], 4294966272 }
  0x1b   :  { %2610 = dma.done.wait [#allocation8], 1024  }
  0x1c   :  { %2611 = vsyncadd [#allocation8], 4294966272 }
  0x1d   :  { %2612 = dma.done.wait [#allocation11], 768  }
  0x1e   :  { %2613 = vsyncadd [#allocation11], 4294966528  ;;  %v2221_v0 = vld [vmem:[#allocation4 + $0x8] sm:$0xff]  ;;  %v2220_v1 = vld [vmem:[#allocation4] sm:$0xff]  ;;  %vm163_vm0 = vcmask 261120   ;;  %s2625_s5 = smov 112  }
  0x1f   :  { %v2727_v2 = vld [vmem:[#allocation2] sm:$0xff]  ;;  %173 = vmatpush.bf16.msra.mxu0 %v2221_v0  ;;  %v2729_v3 = vld [vmem:[#allocation2 + $0x8] sm:$0xff]  ;;  %s2626_s8 = smov 120   ;;  %s2627_s22 = smov 96   ;;  %vm197_vm1 = vcmask 64512   ;;  %vm734_vm2 = vcmask 130048  }
  0x20   :  { %v150_v4 = vpack.c.bf16 %v2729_v3, %v2727_v2  ;;  %s2628_s27 = smov 104   ;;  %s2629_s28 = smov 24   ;;  %vm737_vm3 = vcmask 195584  }
  0x21   :  { %s2630_s29 = smov 16  }
  0x23   :  { %174 = vmatpush.bf16.msra.mxu0 %v2220_v1 }
  0x26   :  { %2075 = vmatmul.msk.bf16.vlgmr.msra.gmra.mxu0 %vm163_vm0, %v150_v4 }
  0xa3   :  { %v2734_v5 = vpop.f32.mrf.mxu0 }
  0xa4   :  { %187 = vrot.lane.b32.xlu0 %v2734_v5, %s2625_s5 }
  0xab   :  { %v2738_v6 = vpop.f32.mrf.mxu0 }
  0xac   :  { %183 = vrot.lane.b32.xlu0 %v2734_v5, %s2626_s8  ;;  %189 = vrot.lane.b32.xlu2 %v2738_v6, %s2625_s5 }
  0xad   :  { %185 = vrot.lane.b32.xlu1 %v2738_v6, %s2626_s8 }
  0xb4   :  { %222 = vrot.lane.b32.xlu0 %v2738_v6, %s2627_s22  ;;  %191 = vrot.lane.b32.xlu2 %v2734_v5, %s2628_s27 }
  0xb5   :  { %193 = vrot.lane.b32.xlu1 %v2738_v6, %s2628_s27 }
  0xbd   :  { %195 = vrot.lane.b32.xlu1 %v2734_v5, %s2627_s22 }
 0x106   :  { %v2758_v8 = vpop.permute.xlu2 %189 }
 0x10e   :  { %v2768_v12 = vpop.permute.xlu2 %191 }
 0x116   :  { %v2754_v7 = vpop.permute.xlu0 %187 }
 0x117   :  { %300 = vrot.lane.b32.xlu2 %v2754_v7, %s2627_s22 }
 0x11e   :  { %v2760_v9 = vpop.permute.xlu0 %183 }
 0x11f   :  { %v2762_v10 = vpop.permute.xlu1 %185  ;;  %248 = vrot.lane.b32.xlu0 %v2760_v9, %s2627_s22 }
 0x120   :  { %274 = vrot.lane.b32.xlu1 %v2762_v10, %s2627_s22  ;;  %v2270_v55 = vpack.i.bf16 %v2762_v10, %v2734_v5 }
 0x126   :  { %v223_v11 = vpop.permute.xlu0 %222 }
 0x127   :  { %v2770_v13 = vpop.permute.xlu1 %193  ;;  %2078 = vmatpush.xpose.msk.msra.mxu2 %vm197_vm1, %v223_v11  ;;  %326 = vrot.lane.b32.xlu0 %v2758_v8, %s2627_s22 }
 0x128   :  { %352 = vrot.lane.b32.xlu1 %v2768_v12, %s2627_s22  ;;  %378 = vrot.lane.b32.xlu2 %v2770_v13, %s2627_s22 }
 0x12a   :  { %2079 = vmatmul.msk.f32.vlgmr.msra.gmra.mxu2 %vm197_vm1, %v2738_v6 }
 0x12f   :  { %v196_v14 = vpop.permute.xlu1 %195 }
 0x130   :  { %2076 = vmatpush.xpose.msk.msra.mxu1 %vm197_vm1, %v196_v14 }
 0x133   :  { %2077 = vmatmul.msk.f32.vlgmr.msra.gmra.mxu1 %vm197_vm1, %v2734_v5 }
 0x171   :  { %v301_v15 = vpop.permute.xlu2 %300 }
 0x172   :  { %2084 = vmatpush.xpose.msk.msrb.mxu2 %vm197_vm1, %v301_v15 }
 0x175   :  { %2085 = vmatmul.msk.f32.vlgmr.msrb.gmra.mxu2 %vm197_vm1, %v2754_v7 }
 0x182   :  { %v379_v16 = vpop.permute.xlu2 %378 }
 0x183   :  { %2090 = vmatpush.xpose.msk.msra.mxu2 %vm197_vm1, %v379_v16 }
 0x186   :  { %2091 = vmatmul.msk.f32.vlgmr.msra.gmra.mxu2 %vm197_vm1, %v2770_v13 }
 0x191   :  { %v249_v17 = vpop.permute.xlu0 %248 }
 0x192   :  { %v275_v18 = vpop.permute.xlu1 %274  ;;  %2080 = vmatpush.xpose.msk.msra.mxu3 %vm197_vm1, %v249_v17 }
 0x193   :  { %2082 = vmatpush.xpose.msk.msrb.mxu1 %vm197_vm1, %v275_v18 }
 0x195   :  { %2081 = vmatmul.msk.f32.vlgmr.msra.gmra.mxu3 %vm197_vm1, %v2760_v9 }
 0x196   :  { %2083 = vmatmul.msk.f32.vlgmr.msrb.gmra.mxu1 %vm197_vm1, %v2762_v10 }
 0x199   :  { %v327_v19 = vpop.permute.xlu0 %326 }
 0x19a   :  { %v353_v20 = vpop.permute.xlu1 %352  ;;  %2086 = vmatpush.xpose.msk.msrb.mxu3 %vm197_vm1, %v327_v19  ;;  %v2285_v19 = vpack.i.bf16 %v2768_v12, %v2758_v8 }
 0x19b   :  { %2088 = vmatpush.xpose.msk.msra.mxu1 %vm197_vm1, %v353_v20 }
 0x19d   :  { %2087 = vmatmul.msk.f32.vlgmr.msrb.gmra.mxu3 %vm197_vm1, %v2758_v8 }
 0x19e   :  { %2089 = vmatmul.msk.f32.vlgmr.msra.gmra.mxu1 %vm197_vm1, %v2768_v12 }
 0x1ad   :  { %v245_v21 = vpop.f32.mrf.mxu2 }
 0x1ae   :  { %v405_v22 = vmul.f32 0.35355338, %v245_v21 }
 0x1b0   :  { %v219_v23 = vpop.f32.mrf.mxu1  ;;  %v415_v24 = vsel %vm197_vm1, %v405_v22, -inf }
 0x1b1   :  { %v404_v25 = vmul.f32 0.35355338, %v219_v23  ;;  %416 = vmax.xlane.f32.xlu1 %v415_v24 }
 0x1b3   :  { %v412_v26 = vsel %vm197_vm1, %v404_v25, -inf }
 0x1b4   :  { %413 = vmax.xlane.f32.xlu2 %v412_v26 }
 0x1f8   :  { %v323_v33 = vpop.f32.mrf.mxu2 }
 0x1f9   :  { %v408_v34 = vmul.f32 0.35355338, %v323_v33 }
 0x1fb   :  { %v424_v38 = vsel %vm197_vm1, %v408_v34, -inf }
 0x209   :  { %v401_v52 = vpop.f32.mrf.mxu2 }
 0x20a   :  { %v411_v53 = vmul.f32 0.35355338, %v401_v52 }
 0x20c   :  { %v433_v54 = vsel %vm197_vm1, %v411_v53, -inf }
 0x213   :  { %v297_v27 = vpop.f32.mrf.mxu1 }
 0x214   :  { %v407_v28 = vmul.f32 0.35355338, %v297_v27 }
 0x216   :  { %v421_v29 = vsel %vm197_vm1, %v407_v28, -inf }
 0x217   :  { %422 = vmax.xlane.f32.xlu0 %v421_v29 }
 0x218   :  { %v271_v30 = vpop.f32.mrf.mxu3 }
 0x219   :  { %v406_v31 = vmul.f32 0.35355338, %v271_v30 }
 0x21b   :  { %v418_v32 = vsel %vm197_vm1, %v406_v31, -inf  ;;  %v375_v39 = vpop.f32.mrf.mxu1 }
 0x21c   :  { %419 = vmax.xlane.f32.xlu2 %v418_v32  ;;  %v410_v42 = vmul.f32 0.35355338, %v375_v39 }
 0x21e   :  { %v430_v47 = vsel %vm197_vm1, %v410_v42, -inf }
 0x220   :  { %v349_v35 = vpop.f32.mrf.mxu3 }
 0x221   :  { %v409_v36 = vmul.f32 0.35355338, %v349_v35  ;;  %v2275_v35 = vpack.i.bf16 %v2760_v9, %v2738_v6 }
 0x223   :  { %v427_v37 = vsel %vm197_vm1, %v409_v36, -inf }
 0x224   :  { %428 = vmax.xlane.f32.xlu1 %v427_v37  ;;  %425 = vmax.xlane.f32.xlu2 %v424_v38  ;;  %v417_v40 = vpop.xlane.xlu1 %416 }
 0x225   :  { %v437_v41 = vsub.f32 %v405_v22, %v417_v40 }
 0x227   :  { %v446_v43 = vmul.f32 1.442695, %v437_v41  ;;  %v414_v44 = vpop.xlane.xlu2 %413 }
 0x228   :  { %v436_v45 = vsub.f32 %v404_v25, %v414_v44 }
 0x229   :  { %2344 = vpow2.f32 %v446_v43 }
 0x22a   :  { %v444_v46 = vmul.f32 1.442695, %v436_v45 }
 0x22c   :  { %2346 = vpow2.f32 %v444_v46  ;;  %431 = vmax.xlane.f32.xlu2 %v430_v47 }
 0x22f   :  { %v2809_v48 = vpop.eup %2344 }
 0x230   :  { %v463_v51 = vsel %vm197_vm1, %v2809_v48, 0.0 }
 0x232   :  { %v2347_v49 = vpop.eup %2346 }
 0x233   :  { %v460_v50 = vsel %vm197_vm1, %v2347_v49, 0.0 }
 0x234   :  { %461 = vadd.xlane.f32.xlu0 %v460_v50  ;;  %464 = vadd.xlane.f32.xlu2 %v463_v51 }
 0x23c   :  { %434 = vmax.xlane.f32.xlu0 %v433_v54 }
 0x250   :  { %2271 = vrot.lane.b32.xlu0 %v2270_v55, %s2615_s21 }
 0x28a   :  { %v423_v59 = vpop.xlane.xlu0 %422 }
 0x28b   :  { %v439_v63 = vsub.f32 %v407_v28, %v423_v59 }
 0x28d   :  { %v450_v4 = vmul.f32 1.442695, %v439_v63 }
 0x28f   :  { %v420_v56 = vpop.xlane.xlu2 %419 }
 0x290   :  { %v438_v57 = vsub.f32 %v406_v31, %v420_v56 }
 0x292   :  { %v448_v58 = vmul.f32 1.442695, %v438_v57 }
 0x294   :  { %2348 = vpow2.f32 %v448_v58 }
 0x297   :  { %v426_v60 = vpop.xlane.xlu2 %425  ;;  %v429_v5 = vpop.xlane.xlu1 %428 }
 0x298   :  { %v440_v61 = vsub.f32 %v408_v34, %v426_v60  ;;  %v441_v11 = vsub.f32 %v409_v36, %v429_v5  ;;  %v2280_v36 = vpack.i.bf16 %v2770_v13, %v2754_v7 }
 0x29a   :  { %v2818_v62 = vpop.eup %2348  ;;  %v452_v0 = vmul.f32 1.442695, %v440_v61  ;;  %v454_v15 = vmul.f32 1.442695, %v441_v11 }
 0x29b   :  { %v466_v1 = vsel %vm197_vm1, %v2818_v62, 0.0 }
 0x29c   :  { %2350 = vpow2.f32 %v452_v0  ;;  %467 = vadd.xlane.f32.xlu0 %v466_v1 }
 0x29d   :  { %2352 = vpow2.f32 %v450_v4 }
 0x29e   :  { %2354 = vpow2.f32 %v454_v15 }
 0x29f   :  { %v432_v20 = vpop.xlane.xlu2 %431 }
 0x2a0   :  { %v442_v24 = vsub.f32 %v410_v42, %v432_v20 }
 0x2a2   :  { %v2822_v10 = vpop.eup %2350  ;;  %v456_v27 = vmul.f32 1.442695, %v442_v24 }
 0x2a3   :  { %v472_v14 = vsel %vm197_vm1, %v2822_v10, 0.0  ;;  %v2353_v17 = vpop.eup %2352 }
 0x2a4   :  { %473 = vadd.xlane.f32.xlu1 %v472_v14  ;;  %v469_v18 = vsel %vm197_vm1, %v2353_v17, 0.0  ;;  %v2829_v22 = vpop.eup %2354 }
 0x2a5   :  { %v475_v26 = vsel %vm197_vm1, %v2829_v22, 0.0 }
 0x2a7   :  { %v462_v16 = vpop.xlane.xlu0 %461  ;;  %v465_v40 = vpop.xlane.xlu2 %464 }
 0x2ac   :  { %470 = vadd.xlane.f32.xlu1 %v469_v18  ;;  %v2223_v18 = vld [vmem:[#allocation6 + $0x8] sm:$0xff] }
 0x2af   :  { %v435_v21 = vpop.xlane.xlu0 %434 }
 0x2b0   :  { %v443_v23 = vsub.f32 %v411_v53, %v435_v21  ;;  %2286 = vrot.lane.b32.xlu0 %v2285_v19, %s2615_s21  ;;  %v2222_v19 = vld [vmem:[#allocation6] sm:$0xff] }
 0x2b2   :  { %v458_v25 = vmul.f32 1.442695, %v443_v23 }
 0x2b4   :  { %2356 = vpow2.f32 %v458_v25  ;;  %476 = vadd.xlane.f32.xlu1 %v475_v26 }
 0x2b5   :  { %2358 = vpow2.f32 %v456_v27 }
 0x2b6   :  { %2360 = vrcp.f32 %v462_v16 }
 0x2ba   :  { %v2357_v28 = vpop.eup %2356 }
 0x2bb   :  { %v481_v8 = vsel %vm197_vm1, %v2357_v28, 0.0  ;;  %v2359_v12 = vpop.eup %2358 }
 0x2bc   :  { %482 = vadd.xlane.f32.xlu2 %v481_v8  ;;  %v2361_v29 = vpop.eup %2360  ;;  %v478_v33 = vsel %vm197_vm1, %v2359_v12, 0.0 }
 0x2bd   :  { %v492_v34 = vmul.f32 %v2361_v29, %v2347_v49 }
 0x2c2   :  { %v2272_v30 = vpop.permute.xlu0 %2271 }
 0x2c3   :  { %v2274_v31 = vunpack.i.h.bf16 %v2272_v30  ;;  %v2273_v32 = vunpack.i.l.bf16 %v2272_v30 }
 0x2c4   :  { %479 = vadd.xlane.f32.xlu2 %v478_v33 }
 0x2c5   :  { %521 = vmatpush.msra.mxu3 %v2273_v32  ;;  %599 = vmatpush.msrb.mxu2 %v2274_v31 }
 0x2c6   :  { %2092 = vmatmul.msk.f32.vlgmr.msra.gmra.mxu3 %vm197_vm1, %v492_v34 }
 0x2cd   :  { %2276 = vrot.lane.b32.xlu1 %v2275_v35, %s2615_s21 }
 0x2dc   :  { %2281 = vrot.lane.b32.xlu2 %v2280_v36, %s2615_s21 }
 0x30f   :  { %v468_v43 = vpop.xlane.xlu0 %467 }
 0x317   :  { %v474_v37 = vpop.xlane.xlu1 %473 }
 0x31f   :  { %v471_v38 = vpop.xlane.xlu1 %470 }
 0x320   :  { %2362 = vrcp.f32 %v471_v38 }
 0x321   :  { %2364 = vrcp.f32 %v465_v40  ;;  %v2631_v40 = vmov 32.0  }
 0x322   :  { %2366 = vrcp.f32 %v474_v37  ;;  %v2287_v53 = vpop.permute.xlu0 %2286 }
 0x323   :  { %v2289_v58 = vunpack.i.h.bf16 %v2287_v53  ;;  %v2288_v59 = vunpack.i.l.bf16 %v2287_v53  ;;  %v2224_v53 = vld [vmem:[#allocation7] sm:$0xff] }
 0x326   :  { %v2363_v39 = vpop.eup %2362 }
 0x327   :  { %v495_v41 = vmul.f32 %v2363_v39, %v2353_v17  ;;  %v477_v44 = vpop.xlane.xlu1 %476  ;;  %v2365_v9 = vpop.eup %2364 }
 0x328   :  { %v2367_v7 = vpop.eup %2366  ;;  %v493_v57 = vmul.f32 %v2365_v9, %v2809_v48 }
 0x329   :  { %2095 = vmatmul.msk.f32.vlgmr.msrb.gmra.mxu2 %vm197_vm1, %v495_v41  ;;  %v496_v54 = vmul.f32 %v2367_v7, %v2822_v10 }
 0x32f   :  { %v483_v42 = vpop.xlane.xlu2 %482 }
 0x330   :  { %2368 = vrcp.f32 %v483_v42 }
 0x331   :  { %2370 = vrcp.f32 %v468_v43 }
 0x332   :  { %2372 = vrcp.f32 %v477_v44 }
 0x336   :  { %v2369_v13 = vpop.eup %2368 }
 0x337   :  { %v480_v6 = vpop.xlane.xlu2 %479  ;;  %v2371_v47 = vpop.eup %2370  ;;  %v499_v55 = vmul.f32 %v2369_v13, %v2357_v28 }
 0x338   :  { %2374 = vrcp.f32 %v480_v6  ;;  %v494_v56 = vmul.f32 %v2371_v47, %v2818_v62  ;;  %v2373_v60 = vpop.eup %2372 }
 0x339   :  { %v497_v62 = vmul.f32 %v2373_v60, %v2829_v22  ;;  %2376 = vrcp.f32 %v2631_v40 }
 0x33e   :  { %v2375_v61 = vpop.eup %2374 }
 0x33f   :  { %v2282_v45 = vpop.permute.xlu2 %2281  ;;  %v2277_v46 = vpop.permute.xlu1 %2276  ;;  %v498_v63 = vmul.f32 %v2375_v61, %v2359_v12 }
 0x340   :  { %v2284_v49 = vunpack.i.h.bf16 %v2282_v45  ;;  %v2283_v50 = vunpack.i.l.bf16 %v2282_v45  ;;  %v2279_v51 = vunpack.i.h.bf16 %v2277_v46  ;;  %v2278_v52 = vunpack.i.l.bf16 %v2277_v46  ;;  %v2377_v41 = vpop.eup %2376 }
 0x341   :  { %v783_v42 = vmul.f32 32.0, %v2377_v41  ;;  %vm787_vm4 = vweird.f32 %v2377_v41 }
 0x342   :  { %625 = vmatpush.msrb.mxu3 %v2283_v50  ;;  %703 = vmatpush.msra.mxu2 %v2284_v49 }
 0x343   :  { %547 = vmatpush.msrb.mxu0 %v2278_v52  ;;  %573 = vmatpush.msrb.mxu1 %v2279_v51  ;;  %v784_v43 = vsub.f32 1.0, %v783_v42  ;;  %v2225_v52 = vld [vmem:[#allocation7 + $0x8] sm:$0xff] }
 0x344   :  { %2096 = vmatmul.msk.f32.vlgmr.msrb.gmra.mxu3 %vm197_vm1, %v496_v54  ;;  %2099 = vmatmul.msk.f32.vlgmr.msra.gmra.mxu2 %vm197_vm1, %v499_v55 }
 0x345   :  { %2093 = vmatmul.msk.f32.vlgmr.msrb.gmra.mxu0 %vm197_vm1, %v493_v57  ;;  %2094 = vmatmul.msk.f32.vlgmr.msrb.gmra.mxu1 %vm197_vm1, %v494_v56  ;;  %v785_v44 = vmul.f32 %v2377_v41, %v784_v43 }
 0x346   :  { %651 = vmatpush.msra.mxu0 %v2288_v59  ;;  %677 = vmatpush.msra.mxu1 %v2289_v58 }
 0x347   :  { %766 = vmatpush.bf16.msra.mxu3 %v2223_v18  ;;  %v786_v6 = vadd.f32 %v2377_v41, %v785_v44 }
 0x348   :  { %857 = vmatpush.bf16.msrb.mxu0 %v2225_v52 }
 0x349   :  { %v523_v48 = vpop.f32.mrf.mxu3  ;;  %v2868_v9 = vsel %vm787_vm4, %v2377_v41, %v786_v6 }
 0x34b   :  { %767 = vmatpush.bf16.msra.mxu3 %v2222_v19 }
 0x34c   :  { %858 = vmatpush.bf16.msrb.mxu0 %v2224_v53 }
 0x34d   :  { %2097 = vmatmul.msk.f32.vlgmr.msra.gmra.mxu0 %vm197_vm1, %v497_v62  ;;  %2098 = vmatmul.msk.f32.vlgmr.msra.gmra.mxu1 %vm197_vm1, %v498_v63 }
 0x3ac   :  { %v601_v0 = vpop.f32.mrf.mxu2 }
 0x3c2   :  { %v549_v1 = vpop.f32.mrf.mxu0  ;;  %v575_v4 = vpop.f32.mrf.mxu1 }
 0x3c3   :  { %v2290_v5 = vpack.i.bf16 %v601_v0, %v575_v4 }
 0x3c5   :  { %2291 = vrot.lane.b32.xlu0 %v2290_v5, %s2621_s13 }
 0x3c7   :  { %v627_v10 = vpop.f32.mrf.mxu3  ;;  %v705_v11 = vpop.f32.mrf.mxu2 }
 0x3ca   :  { %v653_v14 = vpop.f32.mrf.mxu0  ;;  %v679_v15 = vpop.f32.mrf.mxu1 }
 0x3cb   :  { %v2295_v16 = vpack.i.bf16 %v653_v14, %v627_v10  ;;  %v2300_v17 = vpack.i.bf16 %v705_v11, %v679_v15 }
 0x3cd   :  { %2301 = vrot.lane.b32.xlu0 %v2300_v17, %s2629_s28  ;;  %2296 = vrot.lane.b32.xlu1 %v2295_v16, %s2630_s29 }
 0x437   :  { %v2292_v20 = vpop.permute.xlu0 %2291 }
 0x438   :  { %v2294_v21 = vunpack.i.h.bf16 %v2292_v20  ;;  %v2293_v22 = vunpack.i.l.bf16 %v2292_v20  ;;  %v2227_v20 = vld [vmem:[#allocation9 + $0x8] sm:$0xff] }
 0x439   :  { %897 = vmatpush.bf16.msrb.mxu1 %v2227_v20 }
 0x43a   :  { %v732_v8 = vsel %vm197_vm1, %v523_v48, %v2293_v22  ;;  %v733_v12 = vsel %vm197_vm1, %v549_v1, %v2294_v21  ;;  %v2226_v21 = vld [vmem:[#allocation9] sm:$0xff] }
 0x43d   :  { %898 = vmatpush.bf16.msrb.mxu1 %v2226_v21 }
 0x43f   :  { %v2302_v23 = vpop.permute.xlu0 %2301  ;;  %v2297_v24 = vpop.permute.xlu1 %2296 }
 0x440   :  { %v2304_v25 = vunpack.i.h.bf16 %v2302_v23  ;;  %v2303_v26 = vunpack.i.l.bf16 %v2302_v23  ;;  %v2299_v27 = vunpack.i.h.bf16 %v2297_v24  ;;  %v2298_v28 = vunpack.i.l.bf16 %v2297_v24  ;;  %v2340_v23 = vld [vmem:[%s3106_s4] ss:$0 sm:$0xff] }
 0x442   :  { %v736_v29 = vsel %vm734_vm2, %v733_v12, %v2299_v27  ;;  %v735_v30 = vsel %vm734_vm2, %v732_v8, %v2298_v28  ;;  %v2341_v12 = vld [vmem:[%s3108_s6] ss:$0 sm:$0xff] }
 0x443   :  { %v739_v31 = vsel %vm737_vm3, %v736_v29, %v2304_v25  ;;  %v738_v32 = vsel %vm737_vm3, %v735_v30, %v2303_v26 }
 0x444   :  { %v744_v33 = vpack.c.bf16 %v739_v31, %v738_v32 }
 0x446   :  { %2108 = vmatmul.msk.bf16.vlgmr.msra.gmra.mxu3 %vm163_vm0, %v744_v33 }
 0x4c9   :  { %v769_v34 = vpop.f32.mrf.mxu3 }
 0x4ca   :  { %v774_v35 = vadd.f32 %v769_v34, %v2727_v2 }
 0x4cc   :  { %v776_v36 = vsel %vm163_vm0, %v774_v35, 0.0 }
 0x4cd   :  { %777 = vadd.xlane.f32.xlu2 %v776_v36 }
 0x4d1   :  { %v771_v37 = vpop.f32.mrf.mxu3 }
 0x4d2   :  { %v775_v38 = vadd.f32 %v771_v37, %v2729_v3 }
 0x4d4   :  { %v779_v39 = vsel %vm163_vm0, %v775_v38, 0.0 }
 0x4d5   :  { %780 = vadd.xlane.f32.xlu1 %v779_v39 }
 0x540   :  { %v778_v2 = vpop.xlane.xlu2 %777 }
 0x541   :  { %v789_v7 = vmul.f32 %v2868_v9, %v778_v2 }
 0x543   :  { %v791_v13 = vsub.f32 %v774_v35, %v789_v7  ;;  %v2229_v7 = vld [vmem:[#allocation4 + $0x18] sm:$0xff] }
 0x544   :  { %978 = vmatpush.bf16.msrb.mxu2 %v2229_v7 }
 0x545   :  { %v793_v45 = vmul.f32 %v791_v13, %v791_v13 }
 0x547   :  { %v795_v3 = vsel %vm163_vm0, %v793_v45, 0.0 }
 0x548   :  { %796 = vadd.xlane.f32.xlu0 %v795_v3  ;;  %v781_v46 = vpop.xlane.xlu1 %780 }
 0x549   :  { %v790_v47 = vmul.f32 %v2868_v9, %v781_v46 }
 0x54b   :  { %v792_v49 = vsub.f32 %v775_v38, %v790_v47 }
 0x54d   :  { %v794_v50 = vmul.f32 %v792_v49, %v792_v49 }
 0x54f   :  { %v798_v51 = vsel %vm163_vm0, %v794_v50, 0.0 }
 0x550   :  { %799 = vadd.xlane.f32.xlu2 %v798_v51 }
 0x5bb   :  { %v797_v54 = vpop.xlane.xlu0 %796 }
 0x5bc   :  { %v801_v55 = vmul.f32 %v797_v54, %v2868_v9 }
 0x5be   :  { %v803_v56 = vadd.f32 1e-05, %v801_v55 }
 0x5c0   :  { %2378 = vrsqrt.f32 %v803_v56  ;;  %vm811_vm6 = vweird.f32 %v803_v56 }
 0x5c3   :  { %v800_v57 = vpop.xlane.xlu2 %799 }
 0x5c4   :  { %v802_v58 = vmul.f32 %v800_v57, %v2868_v9 }
 0x5c6   :  { %v2379_v59 = vpop.eup %2378  ;;  %v804_v60 = vadd.f32 1e-05, %v802_v58 }
 0x5c7   :  { %v806_v61 = vmul.f32 %v2379_v59, %v803_v56  ;;  %vm812_vm5 = vweird.f32 %v2379_v59 }
 0x5c8   :  { %2380 = vrsqrt.f32 %v804_v60  ;;  %vm813_vm8 = vmor %vm811_vm6, %vm812_vm5  ;;  %vm821_vm9 = vweird.f32 %v804_v60 }
 0x5c9   :  { %v807_v62 = vmul.f32 %v2379_v59, %v806_v61 }
 0x5cb   :  { %v808_v63 = vmul.f32 0.5, %v807_v62 }
 0x5cd   :  { %v809_v0 = vsub.f32 1.5, %v808_v63 }
 0x5ce   :  { %v2381_v48 = vpop.eup %2380 }
 0x5cf   :  { %v816_v1 = vmul.f32 %v2381_v48, %v804_v60  ;;  %v810_v5 = vmul.f32 %v2379_v59, %v809_v0  ;;  %vm822_vm7 = vweird.f32 %v2381_v48 }
 0x5d0   :  { %vm823_vm10 = vmor %vm821_vm9, %vm822_vm7 }
 0x5d1   :  { %v817_v4 = vmul.f32 %v2381_v48, %v816_v1  ;;  %v814_v14 = vsel %vm813_vm8, %v2379_v59, %v810_v5 }
 0x5d2   :  { %v825_v17 = vmul.f32 %v814_v14, %v791_v13  ;;  %v2228_v13 = vld [vmem:[#allocation4 + $0x10] sm:$0xff] }
 0x5d3   :  { %v818_v10 = vmul.f32 0.5, %v817_v4  ;;  %979 = vmatpush.bf16.msrb.mxu2 %v2228_v13 }
 0x5d5   :  { %v819_v11 = vsub.f32 1.5, %v818_v10 }
 0x5d7   :  { %v820_v15 = vmul.f32 %v2381_v48, %v819_v11 }
 0x5d9   :  { %v824_v16 = vsel %vm823_vm10, %v2381_v48, %v820_v15 }
 0x5da   :  { %v826_v18 = vmul.f32 %v824_v16, %v792_v49 }
 0x5dc   :  { %v831_v19 = vpack.c.bf16 %v826_v18, %v825_v17 }
 0x5de   :  { %2117 = vmatmul.msk.bf16.vlgmr.msrb.gmra.mxu0 %vm163_vm0, %v831_v19 }
 0x65b   :  { %v860_v22 = vpop.f32.mrf.mxu0 }
 0x65c   :  { %v861_v24 = vadd.f32 %v2340_v23, %v860_v22 }
 0x65e   :  { %v865_v27 = vmax.f32 %v861_v24, 0.0 }
 0x663   :  { %v862_v25 = vpop.f32.mrf.mxu0 }
 0x664   :  { %v863_v26 = vadd.f32 %v2340_v23, %v862_v25 }
 0x666   :  { %v866_v28 = vmax.f32 %v863_v26, 0.0 }
 0x668   :  { %v871_v8 = vpack.c.bf16 %v866_v28, %v865_v27 }
 0x66a   :  { %2126 = vmatmul.msk.bf16.vlgmr.msrb.gmra.mxu1 %vm163_vm0, %v871_v8 }
 0x6e7   :  { %v900_v29 = vpop.f32.mrf.mxu1 }
 0x6e8   :  { %v901_v30 = vadd.f32 %v2341_v12, %v900_v29 }
 0x6ea   :  { %v905_v31 = vadd.f32 %v901_v30, %v825_v17 }
 0x6ec   :  { %v907_v32 = vsel %vm163_vm0, %v905_v31, 0.0 }
 0x6ed   :  { %908 = vadd.xlane.f32.xlu1 %v907_v32 }
 0x6ef   :  { %v902_v33 = vpop.f32.mrf.mxu1 }
 0x6f0   :  { %v903_v34 = vadd.f32 %v2341_v12, %v902_v33 }
 0x6f2   :  { %v906_v35 = vadd.f32 %v903_v34, %v826_v18 }
 0x6f4   :  { %v910_v36 = vsel %vm163_vm0, %v906_v35, 0.0 }
 0x6f5   :  { %911 = vadd.xlane.f32.xlu0 %v910_v36 }
 0x760   :  { %v909_v37 = vpop.xlane.xlu1 %908 }
 0x761   :  { %v913_v38 = vmul.f32 %v909_v37, %v2868_v9 }
 0x763   :  { %v915_v39 = vsub.f32 %v905_v31, %v913_v38 }
 0x765   :  { %v917_v40 = vmul.f32 %v915_v39, %v915_v39 }
 0x767   :  { %v919_v41 = vsel %vm163_vm0, %v917_v40, 0.0 }
 0x768   :  { %v912_v42 = vpop.xlane.xlu0 %911  ;;  %920 = vadd.xlane.f32.xlu2 %v919_v41 }
 0x769   :  { %v914_v43 = vmul.f32 %v912_v42, %v2868_v9 }
 0x76b   :  { %v916_v44 = vsub.f32 %v906_v35, %v914_v43 }
 0x76d   :  { %v918_v6 = vmul.f32 %v916_v44, %v916_v44 }
 0x76f   :  { %v922_v2 = vsel %vm163_vm0, %v918_v6, 0.0 }
 0x770   :  { %923 = vadd.xlane.f32.xlu1 %v922_v2 }
 0x7db   :  { %v921_v45 = vpop.xlane.xlu2 %920 }
 0x7dc   :  { %v925_v3 = vmul.f32 %v921_v45, %v2868_v9 }
 0x7de   :  { %v927_v46 = vadd.f32 1e-05, %v925_v3 }
 0x7e0   :  { %2382 = vrsqrt.f32 %v927_v46  ;;  %vm935_vm12 = vweird.f32 %v927_v46 }
 0x7e3   :  { %v924_v47 = vpop.xlane.xlu1 %923 }
 0x7e4   :  { %v926_v49 = vmul.f32 %v924_v47, %v2868_v9 }
 0x7e6   :  { %v2383_v50 = vpop.eup %2382  ;;  %v928_v51 = vadd.f32 1e-05, %v926_v49 }
 0x7e7   :  { %v930_v52 = vmul.f32 %v2383_v50, %v927_v46  ;;  %vm936_vm11 = vweird.f32 %v2383_v50 }
 0x7e8   :  { %2384 = vrsqrt.f32 %v928_v51  ;;  %vm937_vm14 = vmor %vm935_vm12, %vm936_vm11  ;;  %vm945_vm15 = vweird.f32 %v928_v51 }
 0x7e9   :  { %v931_v53 = vmul.f32 %v2383_v50, %v930_v52 }
 0x7eb   :  { %v932_v54 = vmul.f32 0.5, %v931_v53 }
 0x7ed   :  { %v933_v56 = vsub.f32 1.5, %v932_v54 }
 0x7ee   :  { %v2385_v55 = vpop.eup %2384 }
 0x7ef   :  { %v940_v57 = vmul.f32 %v2385_v55, %v928_v51  ;;  %v934_v59 = vmul.f32 %v2383_v50, %v933_v56  ;;  %vm946_vm13 = vweird.f32 %v2385_v55 }
 0x7f0   :  { %vm947_vm4 = vmor %vm945_vm15, %vm946_vm13  ;;  %vm1775_vm15 = vcmask 1041409  }
 0x7f1   :  { %v941_v58 = vmul.f32 %v2385_v55, %v940_v57  ;;  %v938_v62 = vsel %vm937_vm14, %v2383_v50, %v934_v59 }
 0x7f2   :  { %v2892_v0 = vmul.f32 %v938_v62, %v915_v39 }
 0x7f3   :  { %v942_v60 = vmul.f32 0.5, %v941_v58 }
 0x7f5   :  { %v943_v61 = vsub.f32 1.5, %v942_v60 }
 0x7f7   :  { %v944_v63 = vmul.f32 %v2385_v55, %v943_v61 }
 0x7f9   :  { %v948_v48 = vsel %vm947_vm4, %v2385_v55, %v944_v63 }
 0x7fa   :  { %v2894_v1 = vmul.f32 %v948_v48, %v916_v44 }
 0x7fc   :  { %v956_v4 = vpack.c.bf16 %v2894_v1, %v2892_v0 }
 0x7fe   :  { %2135 = vmatmul.msk.bf16.vlgmr.msrb.gmra.mxu2 %vm163_vm0, %v956_v4 }
 0x881   :  { %v2899_v5 = vpop.f32.mrf.mxu2 }
 0x882   :  { %992 = vrot.lane.b32.xlu2 %v2899_v5, %s2625_s5 }
 0x889   :  { %v2903_v10 = vpop.f32.mrf.mxu2 }
 0x88a   :  { %994 = vrot.lane.b32.xlu2 %v2903_v10, %s2625_s5  ;;  %998 = vrot.lane.b32.xlu1 %v2903_v10, %s2628_s27 }
 0x88b   :  { %990 = vrot.lane.b32.xlu0 %v2903_v10, %s2626_s8 }
 0x892   :  { %1000 = vrot.lane.b32.xlu1 %v2899_v5, %s2627_s22 }
 0x893   :  { %988 = vrot.lane.b32.xlu0 %v2899_v5, %s2626_s8 }
 0x89b   :  { %996 = vrot.lane.b32.xlu0 %v2899_v5, %s2628_s27 }
 0x8dc   :  { %v2917_v11 = vpop.permute.xlu2 %992 }
 0x8dd   :  { %1104 = vrot.lane.b32.xlu0 %v2917_v11, %s2627_s22 }
 0x8e4   :  { %v2929_v16 = vpop.permute.xlu2 %994 }
 0x8fc   :  { %v2921_v14 = vpop.permute.xlu1 %998 }
 0x8fd   :  { %v2923_v15 = vpop.permute.xlu0 %990  ;;  %1182 = vrot.lane.b32.xlu1 %v2921_v14, %s2627_s22 }
 0x8fe   :  { %1078 = vrot.lane.b32.xlu2 %v2923_v15, %s2627_s22  ;;  %v2305_v50 = vpack.i.bf16 %v2923_v15, %v2899_v5 }
 0x904   :  { %v1001_v17 = vpop.permute.xlu1 %1000 }
 0x905   :  { %v2931_v18 = vpop.permute.xlu0 %988  ;;  %1130 = vrot.lane.b32.xlu1 %v2929_v16, %s2627_s22  ;;  %2136 = vmatpush.xpose.msk.msrb.mxu3 %vm197_vm1, %v1001_v17 }
 0x906   :  { %1026 = vrot.lane.b32.xlu2 %v2903_v10, %s2627_s22  ;;  %1052 = vrot.lane.b32.xlu0 %v2931_v18, %s2627_s22 }
 0x908   :  { %2137 = vmatmul.msk.f32.vlgmr.msrb.gmra.mxu3 %vm197_vm1, %v2899_v5 }
 0x90d   :  { %v2942_v19 = vpop.permute.xlu0 %996 }
 0x90e   :  { %1156 = vrot.lane.b32.xlu2 %v2942_v19, %s2627_s22 }
 0x94f   :  { %v1105_v20 = vpop.permute.xlu0 %1104 }
 0x950   :  { %2144 = vmatpush.xpose.msk.msra.mxu3 %vm197_vm1, %v1105_v20 }
 0x953   :  { %2145 = vmatmul.msk.f32.vlgmr.msra.gmra.mxu3 %vm197_vm1, %v2917_v11 }
 0x958   :  { %v1079_v21 = vpop.permute.xlu2 %1078 }
 0x959   :  { %2142 = vmatpush.xpose.msk.msra.mxu2 %vm197_vm1, %v1079_v21 }
 0x95c   :  { %2143 = vmatmul.msk.f32.vlgmr.msra.gmra.mxu2 %vm197_vm1, %v2923_v15 }
 0x960   :  { %v1027_v22 = vpop.permute.xlu2 %1026 }
 0x961   :  { %2138 = vmatpush.xpose.msk.msra.mxu0 %vm197_vm1, %v1027_v22 }
 0x964   :  { %2139 = vmatmul.msk.f32.vlgmr.msra.gmra.mxu0 %vm197_vm1, %v2903_v10 }
 0x968   :  { %v1157_v26 = vpop.permute.xlu2 %1156 }
 0x96f   :  { %v1183_v23 = vpop.permute.xlu1 %1182 }
 0x970   :  { %2150 = vmatpush.xpose.msk.msrb.mxu2 %vm197_vm1, %v1183_v23 }
 0x973   :  { %2151 = vmatmul.msk.f32.vlgmr.msrb.gmra.mxu2 %vm197_vm1, %v2921_v14 }
 0x977   :  { %v1131_v24 = vpop.permute.xlu1 %1130 }
 0x978   :  { %v1053_v25 = vpop.permute.xlu0 %1052  ;;  %2146 = vmatpush.xpose.msk.msrb.mxu0 %vm197_vm1, %v1131_v24 }
 0x979   :  { %2140 = vmatpush.xpose.msk.msra.mxu1 %vm197_vm1, %v1053_v25 }
 0x97b   :  { %2147 = vmatmul.msk.f32.vlgmr.msrb.gmra.mxu0 %vm197_vm1, %v2929_v16 }
 0x97c   :  { %2141 = vmatmul.msk.f32.vlgmr.msra.gmra.mxu1 %vm197_vm1, %v2931_v18 }
 0x97d   :  { %2148 = vmatpush.xpose.msk.msrb.mxu1 %vm197_vm1, %v1157_v26 }
 0x984   :  { %2149 = vmatmul.msk.f32.vlgmr.msrb.gmra.mxu1 %vm197_vm1, %v2942_v19 }
 0x98b   :  { %v1023_v27 = vpop.f32.mrf.mxu3 }
 0x98c   :  { %v1208_v28 = vmul.f32 0.35355338, %v1023_v27 }
 0x98e   :  { %v1216_v8 = vsel %vm197_vm1, %v1208_v28, -inf }
 0x98f   :  { %1217 = vmax.xlane.f32.xlu0 %v1216_v8 }
 0x9d6   :  { %v1127_v12 = vpop.f32.mrf.mxu3 }
 0x9d7   :  { %v1212_v29 = vmul.f32 0.35355338, %v1127_v12 }
 0x9d9   :  { %v1228_v30 = vsel %vm197_vm1, %v1212_v29, -inf }
 0x9da   :  { %1229 = vmax.xlane.f32.xlu1 %v1228_v30 }
 0x9df   :  { %v1101_v31 = vpop.f32.mrf.mxu2 }
 0x9e0   :  { %v2969_v32 = vmul.f32 0.35355338, %v1101_v31 }
 0x9e1   :  { %v1049_v33 = vpop.f32.mrf.mxu0 }
 0x9e2   :  { %v1209_v34 = vmul.f32 0.35355338, %v1049_v33  ;;  %v1225_v35 = vsel %vm197_vm1, %v2969_v32, -inf }
 0x9e3   :  { %1226 = vmax.xlane.f32.xlu1 %v1225_v35 }
 0x9e4   :  { %v1219_v36 = vsel %vm197_vm1, %v1209_v34, -inf }
 0x9e5   :  { %1220 = vmax.xlane.f32.xlu2 %v1219_v36 }
 0x9f6   :  { %v1205_v46 = vpop.f32.mrf.mxu2 }
 0x9f7   :  { %v1215_v47 = vmul.f32 0.35355338, %v1205_v46 }
 0x9f8   :  { %v1153_v40 = vpop.f32.mrf.mxu0 }
 0x9f9   :  { %v1075_v37 = vpop.f32.mrf.mxu1  ;;  %v1213_v41 = vmul.f32 0.35355338, %v1153_v40  ;;  %v1237_v49 = vsel %vm197_vm1, %v1215_v47, -inf }
 0x9fa   :  { %v1210_v38 = vmul.f32 0.35355338, %v1075_v37 }
 0x9fb   :  { %v1231_v2 = vsel %vm197_vm1, %v1213_v41, -inf }
 0x9fc   :  { %v1222_v39 = vsel %vm197_vm1, %v1210_v38, -inf }
 0x9fd   :  { %1223 = vmax.xlane.f32.xlu0 %v1222_v39 }
 0xa01   :  { %v1179_v42 = vpop.f32.mrf.mxu1 }
 0xa02   :  { %v1214_v43 = vmul.f32 0.35355338, %v1179_v42  ;;  %v1218_v44 = vpop.xlane.xlu0 %1217  ;;  %v2310_v42 = vpack.i.bf16 %v2931_v18, %v2903_v10 }
 0xa03   :  { %v1240_v6 = vsub.f32 %v1208_v28, %v1218_v44 }
 0xa04   :  { %v1234_v7 = vsel %vm197_vm1, %v1214_v43, -inf }
 0xa05   :  { %v1248_v13 = vmul.f32 1.442695, %v1240_v6  ;;  %1232 = vmax.xlane.f32.xlu0 %v1231_v2  ;;  %1235 = vmax.xlane.f32.xlu1 %v1234_v7 }
 0xa07   :  { %2386 = vpow2.f32 %v1248_v13 }
 0xa0d   :  { %v2387_v45 = vpop.eup %2386 }
 0xa0e   :  { %v1264_v3 = vsel %vm197_vm1, %v2387_v45, 0.0 }
 0xa0f   :  { %1265 = vadd.xlane.f32.xlu2 %v1264_v3 }
 0xa17   :  { %1238 = vmax.xlane.f32.xlu2 %v1237_v49 }
 0xa2f   :  { %2306 = vrot.lane.b32.xlu2 %v2305_v50, %s2615_s21 }
 0xa4d   :  { %v1230_v51 = vpop.xlane.xlu1 %1229 }
 0xa4e   :  { %v1244_v52 = vsub.f32 %v1212_v29, %v1230_v51 }
 0xa50   :  { %v1256_v53 = vmul.f32 1.442695, %v1244_v52 }
 0xa52   :  { %2388 = vpow2.f32 %v1256_v53 }
 0xa56   :  { %v1227_v61 = vpop.xlane.xlu1 %1226 }
 0xa57   :  { %v1243_v23 = vsub.f32 %v2969_v32, %v1227_v61 }
 0xa58   :  { %v2982_v54 = vpop.eup %2388  ;;  %v1221_v55 = vpop.xlane.xlu2 %1220 }
 0xa59   :  { %v1241_v56 = vsub.f32 %v1209_v34, %v1221_v55  ;;  %v1276_v57 = vsel %vm197_vm1, %v2982_v54, 0.0  ;;  %v1254_v25 = vmul.f32 1.442695, %v1243_v23 }
 0xa5a   :  { %1277 = vadd.xlane.f32.xlu0 %v1276_v57 }
 0xa5b   :  { %v1250_v58 = vmul.f32 1.442695, %v1241_v56 }
 0xa5d   :  { %2390 = vpow2.f32 %v1250_v58 }
 0xa63   :  { %v2986_v59 = vpop.eup %2390 }
 0xa64   :  { %v1267_v60 = vsel %vm197_vm1, %v2986_v59, 0.0 }
 0xa65   :  { %1268 = vadd.xlane.f32.xlu1 %v1267_v60 }
 0xa70   :  { %v1224_v62 = vpop.xlane.xlu0 %1223 }
 0xa71   :  { %v1242_v63 = vsub.f32 %v1210_v38, %v1224_v62  ;;  %v2320_v38 = vpack.i.bf16 %v2942_v19, %v2929_v16 }
 0xa73   :  { %v1252_v48 = vmul.f32 1.442695, %v1242_v63 }
 0xa75   :  { %2392 = vpow2.f32 %v1252_v48 }
 0xa78   :  { %v1236_v4 = vpop.xlane.xlu1 %1235  ;;  %v1233_v5 = vpop.xlane.xlu0 %1232 }
 0xa79   :  { %v1246_v15 = vsub.f32 %v1214_v43, %v1236_v4  ;;  %v1245_v17 = vsub.f32 %v1213_v41, %v1233_v5  ;;  %v2315_v43 = vpack.i.bf16 %v2921_v14, %v2917_v11 }
 0xa7b   :  { %v2990_v20 = vpop.eup %2392  ;;  %v1260_v21 = vmul.f32 1.442695, %v1246_v15  ;;  %v1258_v22 = vmul.f32 1.442695, %v1245_v17 }
 0xa7c   :  { %v1270_v24 = vsel %vm197_vm1, %v2990_v20, 0.0 }
 0xa7d   :  { %2394 = vpow2.f32 %v1260_v21  ;;  %1271 = vadd.xlane.f32.xlu2 %v1270_v24 }
 0xa7e   :  { %2396 = vpow2.f32 %v1258_v22 }
 0xa7f   :  { %2398 = vpow2.f32 %v1254_v25 }
 0xa82   :  { %v1266_v26 = vpop.xlane.xlu2 %1265 }
 0xa83   :  { %v2995_v27 = vpop.eup %2394  ;;  %2400 = vrcp.f32 %v1266_v26  ;;  %v2231_v26 = vld [vmem:[#allocation6 + $0x18] sm:$0xff] }
 0xa84   :  { %v2997_v28 = vpop.eup %2396  ;;  %v1282_v8 = vsel %vm197_vm1, %v2995_v27, 0.0 }
 0xa85   :  { %1283 = vadd.xlane.f32.xlu1 %v1282_v8  ;;  %v1279_v12 = vsel %vm197_vm1, %v2997_v28, 0.0  ;;  %v2399_v29 = vpop.eup %2398 }
 0xa86   :  { %1280 = vadd.xlane.f32.xlu0 %v1279_v12  ;;  %v1273_v33 = vsel %vm197_vm1, %v2399_v29, 0.0 }
 0xa89   :  { %v2401_v34 = vpop.eup %2400 }
 0xa8a   :  { %v1239_v30 = vpop.xlane.xlu2 %1238  ;;  %v1296_v39 = vmul.f32 %v2401_v34, %v2387_v45 }
 0xa8b   :  { %v1247_v31 = vsub.f32 %v1215_v47, %v1239_v30 }
 0xa8d   :  { %v1262_v32 = vmul.f32 1.442695, %v1247_v31 }
 0xa8e   :  { %1274 = vadd.xlane.f32.xlu0 %v1273_v33 }
 0xa8f   :  { %2402 = vpow2.f32 %v1262_v32 }
 0xa92   :  { %v2307_v35 = vpop.permute.xlu2 %2306 }
 0xa93   :  { %v2309_v36 = vunpack.i.h.bf16 %v2307_v35  ;;  %v2308_v37 = vunpack.i.l.bf16 %v2307_v35 }
 0xa95   :  { %v2403_v40 = vpop.eup %2402  ;;  %2321 = vrot.lane.b32.xlu2 %v2320_v38, %s2615_s21  ;;  %1325 = vmatpush.msrb.mxu3 %v2308_v37 }
 0xa96   :  { %1403 = vmatpush.msra.mxu2 %v2309_v36  ;;  %2152 = vmatmul.msk.f32.vlgmr.msrb.gmra.mxu3 %vm197_vm1, %v1296_v39  ;;  %v1285_v41 = vsel %vm197_vm1, %v2403_v40, 0.0 }
 0xa97   :  { %1286 = vadd.xlane.f32.xlu1 %v1285_v41 }
 0xaa2   :  { %2311 = vrot.lane.b32.xlu0 %v2310_v42, %s2615_s21 }
 0xab0   :  { %2316 = vrot.lane.b32.xlu1 %v2315_v43, %s2615_s21 }
 0xacd   :  { %v1278_v16 = vpop.xlane.xlu0 %1277 }
 0xad8   :  { %v1269_v2 = vpop.xlane.xlu1 %1268 }
 0xaf0   :  { %v1272_v13 = vpop.xlane.xlu2 %1271 }
 0xaf8   :  { %v1284_v10 = vpop.xlane.xlu1 %1283  ;;  %v2322_v3 = vpop.permute.xlu2 %2321 }
 0xaf9   :  { %v1281_v19 = vpop.xlane.xlu0 %1280  ;;  %v2324_v50 = vunpack.i.h.bf16 %v2322_v3  ;;  %v2323_v51 = vunpack.i.l.bf16 %v2322_v3 }
 0xb01   :  { %v1275_v44 = vpop.xlane.xlu0 %1274 }
 0xb02   :  { %2404 = vrcp.f32 %v1275_v44 }
 0xb03   :  { %2406 = vrcp.f32 %v1269_v2 }
 0xb04   :  { %2408 = vrcp.f32 %v1272_v13 }
 0xb05   :  { %2410 = vrcp.f32 %v1284_v10 }
 0xb06   :  { %2412 = vrcp.f32 %v1281_v19 }
 0xb07   :  { %2414 = vrcp.f32 %v1278_v16 }
 0xb08   :  { %v2405_v6 = vpop.eup %2404 }
 0xb09   :  { %v1299_v7 = vmul.f32 %v2405_v6, %v2399_v29  ;;  %v2407_v18 = vpop.eup %2406 }
 0xb0a   :  { %v2409_v45 = vpop.eup %2408  ;;  %v1297_v47 = vmul.f32 %v2407_v18, %v2986_v59  ;;  %v1287_v52 = vpop.xlane.xlu1 %1286 }
 0xb0b   :  { %2155 = vmatmul.msk.f32.vlgmr.msra.gmra.mxu2 %vm197_vm1, %v1299_v7  ;;  %v1298_v49 = vmul.f32 %v2409_v45, %v2990_v20  ;;  %v2411_v53 = vpop.eup %2410  ;;  %2416 = vrcp.f32 %v1287_v52 }
 0xb0c   :  { %v2413_v55 = vpop.eup %2412  ;;  %v1302_v56 = vmul.f32 %v2411_v53, %v2995_v27  ;;  %v2230_v27 = vld [vmem:[#allocation6 + $0x10] sm:$0xff] }
 0xb0d   :  { %v1301_v57 = vmul.f32 %v2413_v55, %v2997_v28  ;;  %v2415_v58 = vpop.eup %2414 }
 0xb0e   :  { %v1300_v63 = vmul.f32 %v2415_v58, %v2982_v54 }
 0xb11   :  { %v2417_v59 = vpop.eup %2416 }
 0xb12   :  { %v1303_v48 = vmul.f32 %v2417_v59, %v2403_v40 }
 0xb14   :  { %v2312_v11 = vpop.permute.xlu0 %2311 }
 0xb15   :  { %v2314_v14 = vunpack.i.h.bf16 %v2312_v11  ;;  %v2313_v46 = vunpack.i.l.bf16 %v2312_v11 }
 0xb17   :  { %1351 = vmatpush.msra.mxu0 %v2313_v46  ;;  %1377 = vmatpush.msra.mxu1 %v2314_v14 }
 0xb18   :  { %2153 = vmatmul.msk.f32.vlgmr.msra.gmra.mxu0 %vm197_vm1, %v1297_v47  ;;  %2154 = vmatmul.msk.f32.vlgmr.msra.gmra.mxu1 %vm197_vm1, %v1298_v49  ;;  %v2232_v49 = vld [vmem:[#allocation7 + $0x10] sm:$0xff] }
 0xb19   :  { %1455 = vmatpush.msrb.mxu0 %v2323_v51  ;;  %1481 = vmatpush.msrb.mxu1 %v2324_v50  ;;  %v1327_v20 = vpop.f32.mrf.mxu3 }
 0xb20   :  { %2157 = vmatmul.msk.f32.vlgmr.msrb.gmra.mxu0 %vm197_vm1, %v1301_v57  ;;  %2158 = vmatmul.msk.f32.vlgmr.msrb.gmra.mxu1 %vm197_vm1, %v1302_v56 }
 0xb22   :  { %v2317_v60 = vpop.permute.xlu1 %2316 }
 0xb23   :  { %v2319_v61 = vunpack.i.h.bf16 %v2317_v60  ;;  %v2318_v62 = vunpack.i.l.bf16 %v2317_v60 }
 0xb25   :  { %1429 = vmatpush.msra.mxu3 %v2318_v62  ;;  %1507 = vmatpush.msrb.mxu2 %v2319_v61 }
 0xb26   :  { %2156 = vmatmul.msk.f32.vlgmr.msra.gmra.mxu3 %vm197_vm1, %v1300_v63  ;;  %2159 = vmatmul.msk.f32.vlgmr.msrb.gmra.mxu2 %vm197_vm1, %v1303_v48 }
 0xb27   :  { %1569 = vmatpush.bf16.msrb.mxu3 %v2231_v26 }
 0xb2b   :  { %1570 = vmatpush.bf16.msrb.mxu3 %v2230_v27 }
 0xb8e   :  { %v1405_v4 = vpop.f32.mrf.mxu2 }
 0xb95   :  { %v1379_v5 = vpop.f32.mrf.mxu1  ;;  %v1353_v17 = vpop.f32.mrf.mxu0 }
 0xb96   :  { %v2325_v15 = vpack.i.bf16 %v1405_v4, %v1379_v5 }
 0xb98   :  { %2326 = vrot.lane.b32.xlu0 %v2325_v15, %s2621_s13 }
 0xb9d   :  { %v1457_v21 = vpop.f32.mrf.mxu0  ;;  %v1483_v22 = vpop.f32.mrf.mxu1 }
 0xba9   :  { %v1431_v23 = vpop.f32.mrf.mxu3  ;;  %v1509_v24 = vpop.f32.mrf.mxu2 }
 0xbaa   :  { %v2330_v25 = vpack.i.bf16 %v1457_v21, %v1431_v23  ;;  %v2335_v54 = vpack.i.bf16 %v1509_v24, %v1483_v22  ;;  %v2235_v23 = vld [vmem:[#allocation9 + $0x18] sm:$0xff]  ;;  %v2234_v24 = vld [vmem:[#allocation9 + $0x10] sm:$0xff] }
 0xbab   :  { %1697 = vmatpush.bf16.msra.mxu1 %v2235_v23 }
 0xbac   :  { %2336 = vrot.lane.b32.xlu1 %v2335_v54, %s2629_s28  ;;  %2331 = vrot.lane.b32.xlu2 %v2330_v25, %s2630_s29  ;;  %v2342_v54 = vld [vmem:[%s3106_s4 + $0x1] ss:$0 sm:$0xff] }
 0xbaf   :  { %1698 = vmatpush.bf16.msra.mxu1 %v2234_v24 }
 0xc06   :  { %v2332_v29 = vpop.permute.xlu2 %2331 }
 0xc07   :  { %v2334_v32 = vunpack.i.h.bf16 %v2332_v29  ;;  %v2333_v33 = vunpack.i.l.bf16 %v2332_v29 }
 0xc0a   :  { %v2327_v28 = vpop.permute.xlu0 %2326 }
 0xc0b   :  { %v2329_v8 = vunpack.i.h.bf16 %v2327_v28  ;;  %v2328_v12 = vunpack.i.l.bf16 %v2327_v28 }
 0xc0d   :  { %v1536_v30 = vsel %vm197_vm1, %v1327_v20, %v2328_v12  ;;  %v1537_v31 = vsel %vm197_vm1, %v1353_v17, %v2329_v8 }
 0xc0e   :  { %v1538_v37 = vsel %vm734_vm2, %v1536_v30, %v2333_v33  ;;  %v1539_v38 = vsel %vm734_vm2, %v1537_v31, %v2334_v32  ;;  %v2343_v30 = vld [vmem:[%s3108_s6 + $0x1] ss:$0 sm:$0xff] }
 0xc1e   :  { %v2337_v34 = vpop.permute.xlu1 %2336 }
 0xc1f   :  { %v2339_v35 = vunpack.i.h.bf16 %v2337_v34  ;;  %v2338_v36 = vunpack.i.l.bf16 %v2337_v34 }
 0xc21   :  { %v1540_v39 = vsel %vm737_vm3, %v1538_v37, %v2338_v36  ;;  %v1541_v40 = vsel %vm737_vm3, %v1539_v38, %v2339_v35 }
 0xc22   :  { %v1547_v41 = vpack.c.bf16 %v1541_v40, %v1540_v39 }
 0xc24   :  { %2168 = vmatmul.msk.bf16.vlgmr.msrb.gmra.mxu3 %vm163_vm0, %v1547_v41 }
 0xca7   :  { %v1572_v42 = vpop.f32.mrf.mxu3 }
 0xca8   :  { %v1577_v43 = vadd.f32 %v1572_v42, %v2892_v0 }
 0xcaa   :  { %v1579_v16 = vsel %vm163_vm0, %v1577_v43, 0.0 }
 0xcab   :  { %1580 = vadd.xlane.f32.xlu0 %v1579_v16 }
 0xcaf   :  { %v1574_v19 = vpop.f32.mrf.mxu3 }
 0xcb0   :  { %v1578_v44 = vadd.f32 %v1574_v19, %v2894_v1  ;;  %v2233_v1 = vld [vmem:[#allocation7 + $0x18] sm:$0xff] }
 0xcb1   :  { %1655 = vmatpush.bf16.msra.mxu0 %v2233_v1 }
 0xcb2   :  { %v1582_v6 = vsel %vm163_vm0, %v1578_v44, 0.0 }
 0xcb3   :  { %1583 = vadd.xlane.f32.xlu2 %v1582_v6 }
 0xcb5   :  { %1656 = vmatpush.bf16.msra.mxu0 %v2232_v49  ;;  %v2236_v49 = vld [vmem:[#allocation10] sm:$0xff] }
 0xd1e   :  { %v1581_v2 = vpop.xlane.xlu0 %1580 }
 0xd1f   :  { %v1585_v7 = vmul.f32 %v1581_v2, %v2868_v9 }
 0xd21   :  { %v1587_v13 = vsub.f32 %v1577_v43, %v1585_v7  ;;  %v2239_v7 = vld [vmem:[#allocation10 + $0x18] sm:$0xff] }
 0xd22   :  { %1833 = vmatpush.bf16.msra.mxu3 %v2239_v7 }
 0xd23   :  { %v1589_v10 = vmul.f32 %v1587_v13, %v1587_v13 }
 0xd25   :  { %v1591_v18 = vsel %vm163_vm0, %v1589_v10, 0.0 }
 0xd26   :  { %1592 = vadd.xlane.f32.xlu1 %v1591_v18  ;;  %v1584_v45 = vpop.xlane.xlu2 %1583  ;;  %v2238_v18 = vld [vmem:[#allocation10 + $0x10] sm:$0xff] }
 0xd27   :  { %v1586_v0 = vmul.f32 %v1584_v45, %v2868_v9  ;;  %1834 = vmatpush.bf16.msra.mxu3 %v2238_v18 }
 0xd29   :  { %v1588_v3 = vsub.f32 %v1578_v44, %v1586_v0 }
 0xd2b   :  { %v1590_v11 = vmul.f32 %v1588_v3, %v1588_v3 }
 0xd2d   :  { %v1594_v14 = vsel %vm163_vm0, %v1590_v11, 0.0 }
 0xd2e   :  { %1595 = vadd.xlane.f32.xlu0 %v1594_v14 }
 0xd99   :  { %v1593_v46 = vpop.xlane.xlu1 %1592 }
 0xd9a   :  { %v1597_v47 = vmul.f32 %v1593_v46, %v2868_v9  ;;  %v2237_v46 = vld [vmem:[#allocation10 + $0x8] sm:$0xff] }
 0xd9b   :  { %1799 = vmatpush.bf16.msra.mxu2 %v2237_v46 }
 0xd9c   :  { %v1599_v50 = vadd.f32 1e-05, %v1597_v47 }
 0xd9e   :  { %2418 = vrsqrt.f32 %v1599_v50  ;;  %vm1607_vm3 = vweird.f32 %v1599_v50 }
 0xd9f   :  { %1800 = vmatpush.bf16.msra.mxu2 %v2236_v49 }
 0xda1   :  { %v1596_v51 = vpop.xlane.xlu0 %1595 }
 0xda2   :  { %v1598_v52 = vmul.f32 %v1596_v51, %v2868_v9 }
 0xda4   :  { %v2419_v53 = vpop.eup %2418  ;;  %v1600_v55 = vadd.f32 1e-05, %v1598_v52 }
 0xda5   :  { %v1602_v56 = vmul.f32 %v2419_v53, %v1599_v50  ;;  %vm1608_vm2 = vweird.f32 %v2419_v53 }
 0xda6   :  { %2420 = vrsqrt.f32 %v1600_v55  ;;  %vm1609_vm6 = vmor %vm1607_vm3, %vm1608_vm2  ;;  %vm1617_vm7 = vweird.f32 %v1600_v55 }
 0xda7   :  { %v1603_v57 = vmul.f32 %v2419_v53, %v1602_v56 }
 0xda9   :  { %v1604_v58 = vmul.f32 0.5, %v1603_v57 }
 0xdab   :  { %v1605_v60 = vsub.f32 1.5, %v1604_v58 }
 0xdac   :  { %v2421_v59 = vpop.eup %2420 }
 0xdad   :  { %v1612_v61 = vmul.f32 %v2421_v59, %v1600_v55  ;;  %v1606_v63 = vmul.f32 %v2419_v53, %v1605_v60  ;;  %vm1618_vm5 = vweird.f32 %v2421_v59 }
 0xdae   :  { %vm1619_vm8 = vmor %vm1617_vm7, %vm1618_vm5  ;;  %vm2048_vm5 = vcmask 1024  }
 0xdaf   :  { %v1613_v62 = vmul.f32 %v2421_v59, %v1612_v61  ;;  %v1610_v5 = vsel %vm1609_vm6, %v2419_v53, %v1606_v63 }
 0xdb0   :  { %v1621_v20 = vmul.f32 %v1610_v5, %v1587_v13 }
 0xdb1   :  { %v1614_v48 = vmul.f32 0.5, %v1613_v62 }
 0xdb3   :  { %v1615_v4 = vsub.f32 1.5, %v1614_v48 }
 0xdb5   :  { %v1616_v15 = vmul.f32 %v2421_v59, %v1615_v4 }
 0xdb7   :  { %v1620_v17 = vsel %vm1619_vm8, %v2421_v59, %v1616_v15 }
 0xdb8   :  { %v1622_v21 = vmul.f32 %v1620_v17, %v1588_v3 }
 0xdba   :  { %v1628_v22 = vpack.c.bf16 %v1622_v21, %v1621_v20 }
 0xdbc   :  { %2178 = vmatmul.msk.bf16.vlgmr.msra.gmra.mxu0 %vm163_vm0, %v1628_v22 }
 0xe39   :  { %v1658_v25 = vpop.f32.mrf.mxu0 }
 0xe3a   :  { %v1659_v26 = vadd.f32 %v2342_v54, %v1658_v25 }
 0xe3c   :  { %v1663_v8 = vmax.f32 %v1659_v26, 0.0 }
 0xe41   :  { %v1660_v27 = vpop.f32.mrf.mxu0 }
 0xe42   :  { %v1661_v28 = vadd.f32 %v2342_v54, %v1660_v27 }
 0xe44   :  { %v1664_v12 = vmax.f32 %v1661_v28, 0.0 }
 0xe46   :  { %v1670_v29 = vpack.c.bf16 %v1664_v12, %v1663_v8 }
 0xe48   :  { %2188 = vmatmul.msk.bf16.vlgmr.msra.gmra.mxu1 %vm163_vm0, %v1670_v29 }
 0xec5   :  { %v1700_v31 = vpop.f32.mrf.mxu1 }
 0xec6   :  { %v1701_v32 = vadd.f32 %v2343_v30, %v1700_v31 }
 0xec8   :  { %v1705_v33 = vadd.f32 %v1701_v32, %v1621_v20  ;;  %v2241_v32 = vld [vmem:[#allocation12 + $0x8] sm:$0xff] }
 0xec9   :  { %1875 = vmatpush.bf16.msrb.mxu0 %v2241_v32 }
 0xeca   :  { %v1707_v34 = vsel %vm163_vm0, %v1705_v33, 0.0 }
 0xecb   :  { %1708 = vadd.xlane.f32.xlu2 %v1707_v34 }
 0xecd   :  { %v1702_v35 = vpop.f32.mrf.mxu1 }
 0xece   :  { %v1703_v36 = vadd.f32 %v2343_v30, %v1702_v35 }
 0xed0   :  { %v1706_v37 = vadd.f32 %v1703_v36, %v1622_v21 }
 0xed2   :  { %v1710_v38 = vsel %vm163_vm0, %v1706_v37, 0.0 }
 0xed3   :  { %1711 = vadd.xlane.f32.xlu1 %v1710_v38 }
 0xf3e   :  { %v1709_v39 = vpop.xlane.xlu2 %1708 }
 0xf3f   :  { %v1713_v40 = vmul.f32 %v1709_v39, %v2868_v9 }
 0xf41   :  { %v1715_v41 = vsub.f32 %v1705_v33, %v1713_v40  ;;  %v2240_v33 = vld [vmem:[#allocation12] sm:$0xff] }
 0xf42   :  { %1876 = vmatpush.bf16.msrb.mxu0 %v2240_v33 }
 0xf43   :  { %v1717_v42 = vmul.f32 %v1715_v41, %v1715_v41 }
 0xf45   :  { %v1719_v43 = vsel %vm163_vm0, %v1717_v42, 0.0 }
 0xf46   :  { %v1712_v16 = vpop.xlane.xlu1 %1711  ;;  %1720 = vadd.xlane.f32.xlu0 %v1719_v43 }
 0xf47   :  { %v1714_v19 = vmul.f32 %v1712_v16, %v2868_v9 }
 0xf49   :  { %v1716_v44 = vsub.f32 %v1706_v37, %v1714_v19 }
 0xf4b   :  { %v1718_v6 = vmul.f32 %v1716_v44, %v1716_v44 }
 0xf4d   :  { %v1722_v2 = vsel %vm163_vm0, %v1718_v6, 0.0 }
 0xf4e   :  { %1723 = vadd.xlane.f32.xlu2 %v1722_v2  ;;  %v1943_v2 = vlaneseq }
 0xf50   :  { %v3077_v18 = vand.u32 127, %v1943_v2 }
 0xf52   :  { %vm1948_vm2 = vcmp.ge.s32.totalorder %v3077_v18, 8 }
 0xfb9   :  { %v1721_v13 = vpop.xlane.xlu0 %1720 }
 0xfba   :  { %v1725_v10 = vmul.f32 %v1721_v13, %v2868_v9 }
 0xfbc   :  { %v1727_v45 = vadd.f32 1e-05, %v1725_v10  ;;  %v3075_v10 = vshrl.u32 %v1943_v2, 7 }
 0xfbe   :  { %2422 = vrsqrt.f32 %v1727_v45  ;;  %vm1735_vm10 = vweird.f32 %v1727_v45  ;;  %vm1947_vm4 = vcmp.eq.s32.totalorder %v3077_v18, %v3075_v10 }
 0xfbf   :  { %vm1949_vm3 = vmor %vm1947_vm4, %vm1948_vm2 }
 0xfc1   :  { %v1724_v0 = vpop.xlane.xlu2 %1723 }
 0xfc2   :  { %v1726_v3 = vmul.f32 %v1724_v0, %v2868_v9 }
 0xfc4   :  { %v2423_v11 = vpop.eup %2422  ;;  %v1728_v14 = vadd.f32 1e-05, %v1726_v3 }
 0xfc5   :  { %v1730_v1 = vmul.f32 %v2423_v11, %v1727_v45  ;;  %vm1736_vm9 = vweird.f32 %v2423_v11 }
 0xfc6   :  { %2424 = vrsqrt.f32 %v1728_v14  ;;  %vm1737_vm11 = vmor %vm1735_vm10, %vm1736_vm9  ;;  %vm1745_vm13 = vweird.f32 %v1728_v14 }
 0xfc7   :  { %v1731_v47 = vmul.f32 %v2423_v11, %v1730_v1 }
 0xfc9   :  { %v1732_v50 = vmul.f32 0.5, %v1731_v47 }
 0xfcb   :  { %v1733_v51 = vsub.f32 1.5, %v1732_v50 }
 0xfcc   :  { %v2425_v52 = vpop.eup %2424 }
 0xfcd   :  { %v1734_v53 = vmul.f32 %v2423_v11, %v1733_v51  ;;  %v1740_v55 = vmul.f32 %v2425_v52, %v1728_v14  ;;  %vm1746_vm12 = vweird.f32 %v2425_v52 }
 0xfce   :  { %vm1747_vm14 = vmor %vm1745_vm13, %vm1746_vm12 }
 0xfcf   :  { %v1738_v56 = vsel %vm1737_vm11, %v2423_v11, %v1734_v53  ;;  %v1741_v57 = vmul.f32 %v2425_v52, %v1740_v55 }
 0xfd0   :  { %v1749_v9 = vmul.f32 %v1738_v56, %v1715_v41 }
 0xfd1   :  { %v1742_v58 = vmul.f32 0.5, %v1741_v57 }
 0xfd2   :  { %v1751_v59 = vsel %vm163_vm0, %v1749_v9, -inf }
 0xfd3   :  { %v1752_v60 = vrot.slane %v1751_v59, 4  ;;  %v1743_v61 = vsub.f32 1.5, %v1742_v58 }
 0xfd5   :  { %v1753_v62 = vmax.f32 %v1751_v59, %v1752_v60  ;;  %v1744_v63 = vmul.f32 %v2425_v52, %v1743_v61 }
 0xfd7   :  { %v1754_v48 = vrot.slane %v1753_v62, 2  ;;  %v1748_v4 = vsel %vm1747_vm14, %v2425_v52, %v1744_v63 }
 0xfd8   :  { %v1750_v5 = vmul.f32 %v1748_v4, %v1716_v44 }
 0xfd9   :  { %v1755_v15 = vmax.f32 %v1753_v62, %v1754_v48 }
 0xfda   :  { %v1758_v17 = vsel %vm163_vm0, %v1750_v5, -inf  ;;  %v1811_v20 = vpack.c.bf16 %v1750_v5, %v1749_v9 }
 0xfdb   :  { %v1759_v21 = vrot.slane %v1758_v17, 4  ;;  %v1756_v22 = vrot.slane %v1755_v15, 1 }
 0xfdc   :  { %2206 = vmatmul.msk.bf16.vlgmr.msra.gmra.mxu3 %vm163_vm0, %v1811_v20 }
 0xfdd   :  { %v1760_v23 = vmax.f32 %v1758_v17, %v1759_v21  ;;  %v1757_v25 = vmax.f32 %v1755_v15, %v1756_v22 }
 0xfdf   :  { %v1761_v24 = vrot.slane %v1760_v23, 2  ;;  %v1769_v28 = vpack.c.bf16 %v1757_v25, %v1757_v25 }
 0xfe1   :  { %v1762_v54 = vmax.f32 %v1760_v23, %v1761_v24  ;;  %v1773_v12 = vunpack.c.l.b16 %v1769_v28 }
 0xfe3   :  { %v1763_v26 = vrot.slane %v1762_v54, 1 }
 0xfe5   :  { %v1764_v27 = vmax.f32 %v1762_v54, %v1763_v26 }
 0xfe7   :  { %v1770_v8 = vpack.c.bf16 %v1764_v27, %v1764_v27 }
 0xfe9   :  { %v1774_v29 = vunpack.c.l.b16 %v1770_v8 }
 0xfeb   :  { %v1776_v30 = vsel %vm1775_vm15, %v1774_v29, %v1773_v12 }
 0xfec   :  { %v1777_v31 = vpack.c.b16 %v1776_v30, %v1776_v30 }
 0xfee   :  { %2197 = vmatmul.msk.bf16.vlgmr.msra.gmra.mxu2 %vm163_vm0, %v1777_v31 }
0x105f   :  { %v1836_v34 = vpop.f32.mrf.mxu3 }
0x1067   :  { %v1838_v39 = vpop.f32.mrf.mxu3 }
0x1071   :  { %v1802_v35 = vpop.f32.mrf.mxu2 }
0x1072   :  { %v1842_v36 = vrot.slane %v1802_v35, 1  ;;  %v1843_v37 = vperm.slane %v1802_v35, 0 }
0x1074   :  { %v1844_v38 = vperm.slane %v1842_v36, 0  ;;  %v1847_v40 = vadd.f32 %v1843_v37, %v1836_v34 }
0x1076   :  { %v1848_v41 = vadd.f32 %v1844_v38, %v1838_v39 }
0x1078   :  { %v1853_v42 = vpack.c.bf16 %v1848_v41, %v1847_v40 }
0x1079   :  { %v1804_v43 = vpop.f32.mrf.mxu2 }
0x107a   :  { %2215 = vmatmul.msk.bf16.vlgmr.msrb.gmra.mxu0 %vm163_vm0, %v1853_v42 }
0x10f7   :  { %v1878_v16 = vpop.f32.mrf.mxu0 }
0x10f8   :  { %1884 = vrot.lane.b32.xlu0 %v1878_v16, %s2627_s22 }
0x10ff   :  { %v1880_v19 = vpop.f32.mrf.mxu0 }
0x1100   :  { %1911 = vrot.lane.b32.xlu1 %v1880_v19, %s2627_s22 }
0x116a   :  { %v1885_v44 = vpop.permute.xlu0 %1884 }
0x116b   :  { %2216 = vmatpush.xpose.msk.msrb.mxu1 %vm163_vm0, %v1885_v44 }
0x116e   :  { %2217 = vmatmul.msk.f32.vlgmr.msrb.gmra.mxu1 %vm163_vm0, %v1878_v16 }
0x1172   :  { %v1912_v6 = vpop.permute.xlu1 %1911 }
0x1173   :  { %2218 = vmatpush.xpose.msk.msrb.mxu2 %vm163_vm0, %v1912_v6 }
0x1176   :  { %2219 = vmatmul.msk.f32.vlgmr.msrb.gmra.mxu2 %vm163_vm0, %v1880_v19  ;;  %v2020_v19 = vmul.u32 8, %v3075_v10 }
0x1178   :  { %v2021_v2 = vadd.s32 %v2020_v19, %v3077_v18 }
0x11eb   :  { %v1907_v7 = vpop.f32.mrf.mxu1 }
0x11ec   :  { %v1937_v13 = vmul.f32 0.17677669, %v1907_v7 }
0x11ee   :  { %2426 = vtanh.f32 %v1937_v13 }
0x11f4   :  { %v2427_v45 = vpop.eup %2426 }
0x11f5   :  { %v1941_v0 = vmul.f32 10.0, %v2427_v45  ;;  %v2022_v45 = vcvt.s32.f32 %v2021_v2 }
0x11f7   :  { %v1952_v3 = vsel %vm1949_vm3, -1e+09, %v1941_v0 }
0x11f8   :  { %v1954_v11 = vsel %vm197_vm1, %v1952_v3, -inf }
0x11f9   :  { %1955 = vmax.xlane.f32.xlu2 %v1954_v11  ;;  %v1934_v14 = vpop.f32.mrf.mxu2 }
0x11fa   :  { %v1938_v1 = vmul.f32 0.17677669, %v1934_v14 }
0x11fc   :  { %2428 = vtanh.f32 %v1938_v1 }
0x1202   :  { %v2429_v46 = vpop.eup %2428 }
0x1203   :  { %v1942_v47 = vmul.f32 10.0, %v2429_v46 }
0x1205   :  { %v1953_v49 = vsel %vm1949_vm3, -1e+09, %v1942_v47 }
0x1206   :  { %v1957_v50 = vsel %vm197_vm1, %v1953_v49, -inf }
0x1207   :  { %1958 = vmax.xlane.f32.xlu2 %v1957_v50 }
0x126c   :  { %v1956_v51 = vpop.xlane.xlu2 %1955 }
0x126d   :  { %v1960_v52 = vrot.slane %v1956_v51, 4 }
0x126f   :  { %v1961_v53 = vmax.f32 %v1956_v51, %v1960_v52 }
0x1271   :  { %v1962_v55 = vrot.slane %v1961_v53, 2 }
0x1273   :  { %v1963_v56 = vmax.f32 %v1961_v53, %v1962_v55 }
0x1275   :  { %v1964_v57 = vrot.slane %v1963_v56, 1 }
0x1277   :  { %v1965_v9 = vmax.f32 %v1963_v56, %v1964_v57 }
0x1279   :  { %v1972_v58 = vsub.f32 %v1952_v3, %v1965_v9 }
0x127a   :  { %v1959_v59 = vpop.xlane.xlu2 %1958 }
0x127b   :  { %v1966_v60 = vrot.slane %v1959_v59, 4  ;;  %v1974_v61 = vmul.f32 1.442695, %v1972_v58 }
0x127d   :  { %v1967_v62 = vmax.f32 %v1959_v59, %v1966_v60  ;;  %2430 = vpow2.f32 %v1974_v61 }
0x127f   :  { %v1968_v63 = vrot.slane %v1967_v62, 2 }
0x1281   :  { %v1969_v48 = vmax.f32 %v1967_v62, %v1968_v63 }
0x1283   :  { %v2431_v4 = vpop.eup %2430  ;;  %v1970_v5 = vrot.slane %v1969_v48, 1 }
0x1284   :  { %v1978_v15 = vsel %vm197_vm1, %v2431_v4, 0.0 }
0x1285   :  { %v1971_v17 = vmax.f32 %v1969_v48, %v1970_v5  ;;  %1979 = vadd.xlane.f32.xlu2 %v1978_v15 }
0x1287   :  { %v1973_v20 = vsub.f32 %v1953_v49, %v1971_v17 }
0x1289   :  { %v1976_v21 = vmul.f32 1.442695, %v1973_v20 }
0x128b   :  { %2432 = vpow2.f32 %v1976_v21 }
0x1291   :  { %v2433_v22 = vpop.eup %2432 }
0x1292   :  { %v1981_v23 = vsel %vm197_vm1, %v2433_v22, 0.0 }
0x1293   :  { %1982 = vadd.xlane.f32.xlu0 %v1981_v23 }
0x12f8   :  { %v1980_v24 = vpop.xlane.xlu2 %1979 }
0x12f9   :  { %v1984_v25 = vrot.slane %v1980_v24, 4 }
0x12fb   :  { %v1985_v54 = vadd.f32 %v1984_v25, %v1980_v24 }
0x12fd   :  { %v1986_v26 = vrot.slane %v1985_v54, 2 }
0x12ff   :  { %v1987_v27 = vadd.f32 %v1986_v26, %v1985_v54 }
0x1301   :  { %v1988_v28 = vrot.slane %v1987_v27, 1 }
0x1303   :  { %v1989_v8 = vadd.f32 %v1988_v28, %v1987_v27 }
0x1305   :  { %2434 = vlog2.f32 %v1989_v8 }
0x1306   :  { %v1983_v12 = vpop.xlane.xlu0 %1982 }
0x1307   :  { %v1990_v29 = vrot.slane %v1983_v12, 4 }
0x1309   :  { %v1991_v30 = vadd.f32 %v1990_v29, %v1983_v12 }
0x130b   :  { %v2435_v31 = vpop.eup %2434  ;;  %v1992_v32 = vrot.slane %v1991_v30, 2 }
0x130c   :  { %v1997_v33 = vmul.f32 0.6931472, %v2435_v31 }
0x130d   :  { %v1993_v34 = vadd.f32 %v1992_v32, %v1991_v30 }
0x130e   :  { %v2000_v35 = vsub.f32 %v1972_v58, %v1997_v33 }
0x130f   :  { %v1994_v36 = vrot.slane %v1993_v34, 1 }
0x1310   :  { %v2002_v37 = vsel %vm197_vm1, %v2000_v35, -inf }
0x1311   :  { %v1995_v38 = vadd.f32 %v1994_v36, %v1993_v34  ;;  %2003 = vmax.xlane.f32.xlu1 %v2002_v37 }
0x1313   :  { %2436 = vlog2.f32 %v1995_v38 }
0x1319   :  { %v2437_v39 = vpop.eup %2436 }
0x131a   :  { %v1999_v40 = vmul.f32 0.6931472, %v2437_v39 }
0x131c   :  { %v2001_v41 = vsub.f32 %v1973_v20, %v1999_v40 }
0x131e   :  { %v2005_v42 = vsel %vm197_vm1, %v2001_v41, -inf }
0x131f   :  { %2006 = vmax.xlane.f32.xlu2 %v2005_v42 }
0x1384   :  { %v2004_v43 = vpop.xlane.xlu1 %2003 }
0x1385   :  { %v2008_v16 = vrot.slane %v2004_v43, 4 }
0x1387   :  { %v2009_v44 = vmax.f32 %v2004_v43, %v2008_v16 }
0x1389   :  { %v2010_v6 = vrot.slane %v2009_v44, 2 }
0x138b   :  { %v2011_v7 = vmax.f32 %v2009_v44, %v2010_v6 }
0x138d   :  { %v2012_v13 = vrot.slane %v2011_v7, 1 }
0x138f   :  { %v2013_v0 = vmax.f32 %v2011_v7, %v2012_v13 }
0x1391   :  { %vm2023_vm0 = vcmp.ge.f32.partialorder %v2000_v35, %v2013_v0 }
0x1392   :  { %v2007_v3 = vpop.xlane.xlu2 %2006  ;;  %v2025_v11 = vsel %vm2023_vm0, %v2022_v45, 1.0737418e+09 }
0x1393   :  { %v2014_v14 = vrot.slane %v2007_v3, 4  ;;  %v2027_v1 = vsel %vm197_vm1, %v2025_v11, inf }
0x1394   :  { %2028 = vmin.xlane.f32.xlu2 %v2027_v1 }
0x1395   :  { %v2015_v46 = vmax.f32 %v2007_v3, %v2014_v14 }
0x1397   :  { %v2016_v47 = vrot.slane %v2015_v46, 2 }
0x1399   :  { %v2017_v49 = vmax.f32 %v2015_v46, %v2016_v47 }
0x139b   :  { %v2018_v50 = vrot.slane %v2017_v49, 1 }
0x139d   :  { %v2019_v10 = vmax.f32 %v2017_v49, %v2018_v50 }
0x139f   :  { %vm2024_vm6 = vcmp.ge.f32.partialorder %v2001_v41, %v2019_v10  ;;  %v2052_v18 = vsel %vm1775_vm15, %v2019_v10, %v2013_v0 }
0x13a0   :  { %v2026_v51 = vsel %vm2024_vm6, %v2022_v45, 1.0737418e+09  ;;  %2054 = vst.msk [vmem:[%s3112_s10] sm:$0x3] %vm2048_vm5, %v2052_v18 }
0x13a1   :  { %v2030_v52 = vsel %vm197_vm1, %v2026_v51, inf }
0x13a2   :  { %2031 = vmin.xlane.f32.xlu2 %v2030_v52 }
0x1407   :  { %v2029_v53 = vpop.xlane.xlu2 %2028 }
0x1408   :  { %v2033_v55 = vrot.slane %v2029_v53, 4 }
0x140a   :  { %v2034_v56 = vmin.f32 %v2029_v53, %v2033_v55 }
0x140c   :  { %v2035_v57 = vrot.slane %v2034_v56, 2 }
0x140e   :  { %v2036_v9 = vmin.f32 %v2034_v56, %v2035_v57 }
0x1410   :  { %v2037_v59 = vrot.slane %v2036_v9, 1 }
0x1412   :  { %v2038_v62 = vmin.f32 %v2036_v9, %v2037_v59 }
0x1414   :  { %v2243_v4 = vceil.f32 %v2038_v62  ;;  %v2244_v5 = vfloor.f32 %v2038_v62  ;;  %vm2242_vm7 = vcmp.lt.s32.totalorder %v2038_v62, 0 }
0x1415   :  { %v2032_v58 = vpop.xlane.xlu2 %2031 }
0x1416   :  { %v2039_v60 = vrot.slane %v2032_v58, 4  ;;  %v2245_v20 = vsel %vm2242_vm7, %v2243_v4, %v2244_v5 }
0x1417   :  { %v2246_v24 = vcvt.f32.s32 %v2245_v20 }
0x1418   :  { %v2040_v61 = vmin.f32 %v2032_v58, %v2039_v60 }
0x141a   :  { %v2041_v63 = vrot.slane %v2040_v61, 2 }
0x141c   :  { %v2042_v48 = vmin.f32 %v2040_v61, %v2041_v63 }
0x141e   :  { %v2043_v15 = vrot.slane %v2042_v48, 1 }
0x1420   :  { %v2044_v17 = vmin.f32 %v2042_v48, %v2043_v15 }
0x1422   :  { %vm2247_vm1 = vcmp.lt.s32.totalorder %v2044_v17, 0  ;;  %v2248_v21 = vceil.f32 %v2044_v17  ;;  %v2249_v22 = vfloor.f32 %v2044_v17 }
0x1424   :  { %v2250_v23 = vsel %vm2247_vm1, %v2248_v21, %v2249_v22 }
0x1425   :  { %v2251_v25 = vcvt.f32.s32 %v2250_v23 }
0x1427   :  { %v2047_v54 = vsel %vm1775_vm15, %v2251_v25, %v2246_v24 }
0x1428   :  { %2049 = vst.msk [vmem:[%s3111_s9] sm:$0x3] %vm2048_vm5, %v2047_v54 }
0x1429   :  { %2063 = vsyncpa [#allocation3], 1 }
0x142a   :  { %2064 = vsyncpa [#allocation5], 1 }
0x142b   :  { %2065 = vsyncpa [#allocation8], 1 }
0x142c   :  { %2066 = vsyncpa [#allocation11], 1 }

</bundles_post_ra>
